<compile_context>
chip_gen: v7x
topology: tpu7x:2x2x1
jax: 0.10.0
libtpu: 0.0.40
codegen_flags: <defaults>
</compile_context>

<pallas_src>
import jax
import jax.numpy as jnp
from jax.experimental import pallas as pl
from jax.experimental.pallas import tpu as pltpu

LANE = 128
# Matmul operand dtype fed to the MXU *and* the HBM storage dtype of weights /
# padded activations (bf16 halves DMA bytes; f32 accumulation is kept).
MXU_DTYPE = jnp.bfloat16


def _round_up(x, n=LANE):
    return ((x + n - 1) // n) * n


# ----------------------------------------------------------------------------
# Fused kernel
# ----------------------------------------------------------------------------
def _geu(x, w1, wg, vecs):
    """Gated_Embedding_Unit on a full (B, D) block.

    x    : (B, DIN) bf16     w1 : (DIN, D) bf16     wg : (D, D) bf16
    vecs : (4, D) f32, rows = [fc.bias, cg.fc.bias, bn.gamma, bn.beta]
    """
    b1, bg = vecs[0:1, :], vecs[1:2, :]
    gamma, beta = vecs[2:3, :], vecs[3:4, :]
    # fc (bf16 operands on the MXU, f32 accumulation)
    h = jnp.dot(x, w1, preferred_element_type=jnp.float32) + b1
    # Context_Gating fc
    g = jnp.dot(h.astype(MXU_DTYPE), wg, preferred_element_type=jnp.float32) + bg
    # BatchNorm1d (training mode: batch stats, biased variance, eps=1e-5).
    # NOTE: only correct because the full batch lives in this single block —
    # batch tiling would require a cross-tile mean/var reduction.
    mean = jnp.mean(g, axis=0, keepdims=True)
    var = jnp.mean(jnp.square(g - mean), axis=0, keepdims=True)
    g = (g - mean) * jax.lax.rsqrt(var + 1e-5) * gamma + beta
    # GLU over cat((h, g), dim=1)  ==  h * sigmoid(g)
    h = h * jax.nn.sigmoid(g)
    # F.normalize: x / max(||x||, 1e-12) == x * rsqrt(max(sum(x^2), 1e-24))  (EUP)
    sumsq = jnp.sum(h * h, axis=1, keepdims=True)
    return h * jax.lax.rsqrt(jnp.maximum(sumsq, 1e-24))


def mee_fused_kernel(text_ref, video_ref,
                     t_w_ref, t_v_ref, v_w_ref, v_v_ref,
                     moe_ref, avail_ref, o_ref):
    """Whole MEE conf-matrix in one invocation; modality loop unrolled."""
    M = video_ref.shape[0]
    TPAD = text_ref.shape[1]
    VPAD = video_ref.shape[2]
    B = o_ref.shape[0]

    text = text_ref[...]                              # (B, TPAD) bf16, load once
    num = jnp.zeros((B, B), jnp.float32)
    den = jnp.zeros((B, B), jnp.float32)

    for m in range(M):                                # static, fully unrolled
        # Packed weights: rows [:DIN] = fc.w, rows [DIN:] = Context_Gating.fc.w
        # (slices are (8,128)-tile aligned -> no relayout copies).
        tw = t_w_ref[m]
        vw = v_w_ref[m]
        t_embd = _geu(text, tw[:TPAD], tw[TPAD:], t_v_ref[m])
        v_embd = _geu(video_ref[m], vw[:VPAD], vw[VPAD:], v_v_ref[m])

        # (B, B) similarity: contract directly on the feature dim (QK^T-style
        # lane-lane contraction; Mosaic handles the layout, no VMEM transpose).
        sim = jax.lax.dot_general(
            t_embd.astype(MXU_DTYPE), v_embd.astype(MXU_DTYPE),
            dimension_numbers=(((1,), (1,)), ((), ())),
            preferred_element_type=jnp.float32)

        # Mixture weight pieces on the VPU:
        #   outer[i, j] = moe[i, m] * avail[m, j]
        outer = moe_ref[m] * avail_ref[m]             # (B,1) * (1,B) -> (B,B)
        num = num + outer * sim
        den = den + outer

    # conf = sum_m (outer_m / den) * sim_m  ==  num / den   (den clamped as in ref)
    o_ref[...] = num / jnp.maximum(den, 1e-12)


def mee_conf_matrix(text_p, video_p, t_w, t_v, v_w, v_v, moe_col, avail_row):
    """Single grid-less pallas_call; all operands resident in VMEM."""
    B = text_p.shape[0]
    return pl.pallas_call(
        mee_fused_kernel,
        out_shape=jax.ShapeDtypeStruct((B, B), jnp.float32),
        compiler_params=pltpu.CompilerParams(vmem_limit_bytes=64 * 1024 * 1024),
    )(text_p, video_p, t_w, t_v, v_w, v_v, moe_col, avail_row)


# ----------------------------------------------------------------------------
# Parameters (mimic nn.Linear / nn.BatchNorm1d init) + lane padding / packing
# ----------------------------------------------------------------------------
def _linear_params(key, din, dout):
    k1, k2 = jax.random.split(key)
    bound = 1.0 / jnp.sqrt(jnp.float32(din))
    w = jax.random.uniform(k1, (din, dout), jnp.float32, -bound, bound)
    b = jax.random.uniform(k2, (1, dout), jnp.float32, -bound, bound)
    return w, b


def make_geu_params(key, din, dout):
    k1, k2 = jax.random.split(key)
    w1, b1 = _linear_params(k1, din, dout)
    wg, bg = _linear_params(k2, dout, dout)
    return {"w1": w1, "b1": b1,                        # Gated_Embedding_Unit.fc
            "wg": wg, "bg": bg,                        # Context_Gating.fc
            "gamma": jnp.ones((1, dout), jnp.float32),   # BatchNorm1d.weight
            "beta": jnp.zeros((1, dout), jnp.float32)}   # BatchNorm1d.bias


def _pad2(a, rows, cols, dtype=None):
    r, c = a.shape
    out = jnp.pad(a, ((0, rows - r), (0, cols - c)))
    return out if dtype is None else out.astype(dtype)


def pack_geu_params(per_mod, din_pad, dout_pad):
    """Zero-pad to lane-dense shapes and pack each modality's GEU params into
    two stacked arrays (fewer DMA descriptors / VMEM tiles):
      wcat : (M, din_pad + dout_pad, dout_pad) bf16  -- rows [:din_pad]=fc.w,
             rows [din_pad:] = Context_Gating.fc.w
      vecs : (M, 4, dout_pad) f32 -- rows = [fc.b, cg.fc.b, bn.gamma, bn.beta]
    Zero padding is mathematically inert through fc / gating / BN / GLU / L2.
    """
    wcat = jnp.stack([
        jnp.concatenate([_pad2(p["w1"], din_pad, dout_pad),
                         _pad2(p["wg"], dout_pad, dout_pad)], axis=0)
        for p in per_mod]).astype(MXU_DTYPE)
    vecs = jnp.stack([
        jnp.concatenate([_pad2(p["b1"], 1, dout_pad),
                         _pad2(p["bg"], 1, dout_pad),
                         _pad2(p["gamma"], 1, dout_pad),
                         _pad2(p["beta"], 1, dout_pad)], axis=0)
        for p in per_mod]).astype(jnp.float32)
    return {"wcat": wcat, "vecs": vecs}


# ----------------------------------------------------------------------------
# MEE forward (conf=True branch)
# ----------------------------------------------------------------------------
def mee_forward(text, video, ind, params, modalities):
    B = text.shape[0]
    tp = params["text_GU_packed"]
    vp = params["video_GU_packed"]
    DPAD = tp["wcat"].shape[2]
    TPAD = tp["wcat"].shape[1] - DPAD
    VPAD = vp["wcat"].shape[1] - DPAD

    # mixture-of-experts softmax + availability (tiny (B, M) XLA glue, f32)
    moe = jax.nn.softmax(text @ params["moe_w"] + params["moe_b"], axis=1)   # (B,M)
    avail = jnp.stack([ind[m] for m in modalities], axis=0).astype(jnp.float32)
    moe_col = jnp.transpose(moe)[:, :, None]          # (M, B, 1) text-row weights
    avail_row = avail[:, None, :]                     # (M, 1, B) video-col mask

    # lane-dense bf16 activations for the kernel
    text_p = _pad2(text, B, TPAD, MXU_DTYPE)                              # (B,TPAD)
    video_p = jnp.stack([_pad2(video[m], B, VPAD, MXU_DTYPE)
                         for m in modalities])                            # (M,B,VPAD)

    return mee_conf_matrix(text_p, video_p,
                           tp["wcat"], tp["vecs"], vp["wcat"], vp["vecs"],
                           moe_col, avail_row)


# ----------------------------------------------------------------------------
# Pure-JAX reference (f32, HIGHEST precision) for correctness check
# ----------------------------------------------------------------------------
def _geu_ref(x, p):
    hi = jax.lax.Precision.HIGHEST
    h = jnp.dot(x, p["w1"], precision=hi) + p["b1"]
    g = jnp.dot(h, p["wg"], precision=hi) + p["bg"]
    mean = jnp.mean(g, axis=0, keepdims=True)
    var = jnp.mean((g - mean) ** 2, axis=0, keepdims=True)
    g = (g - mean) / jnp.sqrt(var + 1e-5) * p["gamma"] + p["beta"]
    h = h * jax.nn.sigmoid(g)
    n = jnp.sqrt(jnp.sum(h * h, axis=1, keepdims=True))
    return h / jnp.maximum(n, 1e-12)


def mee_forward_ref(text, video, ind, params, modalities):
    hi = jax.lax.Precision.HIGHEST
    moe = jax.nn.softmax(text @ params["moe_w"] + params["moe_b"], axis=1)
    avail = jnp.stack([ind[m] for m in modalities], axis=1).astype(jnp.float32)
    w = avail[None, :, :] * moe[:, None, :]
    w = w / jnp.maximum(jnp.sum(w, axis=2, keepdims=True), 1e-12)
    B = text.shape[0]
    conf = jnp.zeros((B, B), jnp.float32)
    for i, m in enumerate(modalities):
        t = _geu_ref(text, params["text_GU"][m])
        v = _geu_ref(video[m], params["video_GU"][m])
        conf = conf + w[:, :, i] * jnp.dot(t, v.T, precision=hi)
    return conf


# ----------------------------------------------------------------------------
# Demo
# ----------------------------------------------------------------------------
if __name__ == "__main__":
    key = jax.random.PRNGKey(0)

    B = 8
    text_dim = 32
    video_modality_dim = {"mod0": (16, 32), "mod1": (24, 48)}
    modalities = list(video_modality_dim.keys())
    n_mod = len(modalities)

    TPAD = _round_up(text_dim)
    VPAD = _round_up(max(v[0] for v in video_modality_dim.values()))
    DPAD = _round_up(max(v[1] for v in video_modality_dim.values()))

    keys = jax.random.split(key, 8)

    params = {"video_GU": {}, "text_GU": {}}
    params["video_GU"]["mod0"] = make_geu_params(keys[0], *video_modality_dim["mod0"])
    params["video_GU"]["mod1"] = make_geu_params(keys[1], *video_modality_dim["mod1"])
    params["text_GU"]["mod0"] = make_geu_params(keys[2], text_dim,
                                                video_modality_dim["mod0"][1])
    params["text_GU"]["mod1"] = make_geu_params(keys[3], text_dim,
                                                video_modality_dim["mod1"][1])
    params["moe_w"], params["moe_b"] = _linear_params(keys[4], text_dim, n_mod)

    # lane-padded, bf16, modality-packed copies consumed by the fused kernel
    params["text_GU_packed"] = pack_geu_params(
        [params["text_GU"][m] for m in modalities], TPAD, DPAD)
    params["video_GU_packed"] = pack_geu_params(
        [params["video_GU"][m] for m in modalities], VPAD, DPAD)

    # inputs
    text = jax.random.normal(keys[5], (B, text_dim), jnp.float32)
    video = {
        "mod0": jax.random.normal(keys[6], (B, video_modality_dim["mod0"][0]),
                                  jnp.float32),
        "mod1": jax.random.normal(keys[7], (B, video_modality_dim["mod1"][0]),
                                  jnp.float32),
    }
    # availability indicators (at least one modality available per clip)
    ind = {
        "mod0": jnp.ones((B,), jnp.float32),
        "mod1": jnp.array([1, 0, 1, 1, 0, 1, 1, 0], jnp.float32),
    }

    fwd = jax.jit(lambda t, v, i, p: mee_forward(t, v, i, p, modalities))
    conf_matrix = fwd(text, video, ind, params)
    jax.block_until_ready(conf_matrix)
    assert conf_matrix.shape == (B, B)

    ref = mee_forward_ref(text, video, ind, params, modalities)
    max_err = float(jnp.max(jnp.abs(conf_matrix - ref)))
    # Tolerance sized for bf16 operand storage (values are O(1) weighted
    # cosine similarities; f32 reference above).
    assert max_err < 2e-2, f"mismatch vs reference: max_err={max_err}"

    print("KERNEL_OK")
</pallas_src>

<mosaic_0001>
module attributes {stable_mosaic.version = 11 : i64} {
  func.func @mee_fused_kernel(%arg0: memref<8x128xbf16, #tpu.memory_space<vmem>>, %arg1: memref<2x8x128xbf16, #tpu.memory_space<vmem>>, %arg2: memref<2x256x128xbf16, #tpu.memory_space<vmem>>, %arg3: memref<2x4x128xf32, #tpu.memory_space<vmem>>, %arg4: memref<2x256x128xbf16, #tpu.memory_space<vmem>>, %arg5: memref<2x4x128xf32, #tpu.memory_space<vmem>>, %arg6: memref<2x8x1xf32, #tpu.memory_space<vmem>>, %arg7: memref<2x1x8xf32, #tpu.memory_space<vmem>>, %arg8: memref<8x8xf32, #tpu.memory_space<vmem>>) attributes {dimension_semantics = [], scalar_prefetch = 0 : i64, scratch_operands = 0 : i64, tpu.core_type = #tpu.core_type<tc>} {
    %c0 = arith.constant 0 : index
    %c0_0 = arith.constant 0 : index
    %0 = vector.load %arg0[%c0, %c0_0] : memref<8x128xbf16, #tpu.memory_space<vmem>>, vector<8x128xbf16>
    %cst = arith.constant 0.000000e+00 : f32
    %1 = vector.broadcast %cst : f32 to vector<8x8xf32>
    %cst_1 = arith.constant 0.000000e+00 : f32
    %2 = vector.broadcast %cst_1 : f32 to vector<8x8xf32>
    %c0_2 = arith.constant 0 : index
    %c0_3 = arith.constant 0 : index
    %c0_4 = arith.constant 0 : index
    %3 = vector.load %arg2[%c0_2, %c0_3, %c0_4] : memref<2x256x128xbf16, #tpu.memory_space<vmem>>, vector<1x256x128xbf16>
    %4 = vector.shape_cast %3 : vector<1x256x128xbf16> to vector<256x128xbf16>
    %c0_5 = arith.constant 0 : index
    %c0_6 = arith.constant 0 : index
    %c0_7 = arith.constant 0 : index
    %5 = vector.load %arg4[%c0_5, %c0_6, %c0_7] : memref<2x256x128xbf16, #tpu.memory_space<vmem>>, vector<1x256x128xbf16>
    %6 = vector.shape_cast %5 : vector<1x256x128xbf16> to vector<256x128xbf16>
    %7 = vector.extract_strided_slice %4 {offsets = [0, 0], sizes = [128, 128], strides = [1, 1]} : vector<256x128xbf16> to vector<128x128xbf16>
    %8 = vector.extract_strided_slice %4 {offsets = [128, 0], sizes = [128, 128], strides = [1, 1]} : vector<256x128xbf16> to vector<128x128xbf16>
    %c0_8 = arith.constant 0 : index
    %c0_9 = arith.constant 0 : index
    %c0_10 = arith.constant 0 : index
    %9 = vector.load %arg3[%c0_8, %c0_9, %c0_10] : memref<2x4x128xf32, #tpu.memory_space<vmem>>, vector<1x4x128xf32>
    %10 = vector.shape_cast %9 : vector<1x4x128xf32> to vector<4x128xf32>
    %11 = vector.extract_strided_slice %10 {offsets = [0, 0], sizes = [1, 128], strides = [1, 1]} : vector<4x128xf32> to vector<1x128xf32>
    %12 = vector.extract_strided_slice %10 {offsets = [1, 0], sizes = [1, 128], strides = [1, 1]} : vector<4x128xf32> to vector<1x128xf32>
    %13 = vector.extract_strided_slice %10 {offsets = [2, 0], sizes = [1, 128], strides = [1, 1]} : vector<4x128xf32> to vector<1x128xf32>
    %14 = vector.extract_strided_slice %10 {offsets = [3, 0], sizes = [1, 128], strides = [1, 1]} : vector<4x128xf32> to vector<1x128xf32>
    %cst_11 = arith.constant dense<0.000000e+00> : vector<8x128xf32>
    %15 = tpu.matmul %0, %7, %cst_11 {dimension_numbers = #tpu.dot_dimension_numbers<[1], [0], [0], [1], [0, 0, 1, 1], [], []>} : vector<8x128xbf16>, vector<128x128xbf16>, vector<8x128xf32> -> vector<8x128xf32>
    %16 = vector.broadcast %11 : vector<1x128xf32> to vector<8x128xf32>
    %17 = arith.addf %15, %16 : vector<8x128xf32>
    %18 = arith.truncf %17 : vector<8x128xf32> to vector<8x128xbf16>
    %cst_12 = arith.constant dense<0.000000e+00> : vector<8x128xf32>
    %19 = tpu.matmul %18, %8, %cst_12 {dimension_numbers = #tpu.dot_dimension_numbers<[1], [0], [0], [1], [0, 0, 1, 1], [], []>} : vector<8x128xbf16>, vector<128x128xbf16>, vector<8x128xf32> -> vector<8x128xf32>
    %20 = vector.broadcast %12 : vector<1x128xf32> to vector<8x128xf32>
    %21 = arith.addf %19, %20 : vector<8x128xf32>
    %cst_13 = arith.constant dense<0.000000e+00> : vector<128xf32>
    %22 = vector.multi_reduction <add>, %21, %cst_13 [0] : vector<8x128xf32> to vector<128xf32>
    %23 = vector.shape_cast %22 : vector<128xf32> to vector<1x128xf32>
    %cst_14 = arith.constant 8.000000e+00 : f32
    %24 = vector.broadcast %cst_14 : f32 to vector<1x128xf32>
    %25 = arith.divf %23, %24 : vector<1x128xf32>
    %26 = vector.broadcast %25 : vector<1x128xf32> to vector<8x128xf32>
    %27 = arith.subf %21, %26 : vector<8x128xf32>
    %28 = arith.mulf %27, %27 : vector<8x128xf32>
    %cst_15 = arith.constant dense<0.000000e+00> : vector<128xf32>
    %29 = vector.multi_reduction <add>, %28, %cst_15 [0] : vector<8x128xf32> to vector<128xf32>
    %30 = vector.shape_cast %29 : vector<128xf32> to vector<1x128xf32>
    %cst_16 = arith.constant 8.000000e+00 : f32
    %31 = vector.broadcast %cst_16 : f32 to vector<1x128xf32>
    %32 = arith.divf %30, %31 : vector<1x128xf32>
    %33 = vector.broadcast %25 : vector<1x128xf32> to vector<8x128xf32>
    %34 = arith.subf %21, %33 : vector<8x128xf32>
    %cst_17 = arith.constant 9.99999974E-6 : f32
    %35 = vector.broadcast %cst_17 : f32 to vector<1x128xf32>
    %36 = arith.addf %32, %35 : vector<1x128xf32>
    %37 = math.rsqrt %36 : vector<1x128xf32>
    %38 = vector.broadcast %37 : vector<1x128xf32> to vector<8x128xf32>
    %39 = arith.mulf %34, %38 : vector<8x128xf32>
    %40 = vector.broadcast %13 : vector<1x128xf32> to vector<8x128xf32>
    %41 = arith.mulf %39, %40 : vector<8x128xf32>
    %42 = vector.broadcast %14 : vector<1x128xf32> to vector<8x128xf32>
    %43 = arith.addf %41, %42 : vector<8x128xf32>
    %44 = arith.negf %43 : vector<8x128xf32>
    %45 = math.exp %44 : vector<8x128xf32>
    %cst_18 = arith.constant 1.000000e+00 : f32
    %46 = vector.broadcast %cst_18 : f32 to vector<8x128xf32>
    %47 = arith.addf %46, %45 : vector<8x128xf32>
    %48 = arith.divf %46, %47 : vector<8x128xf32>
    %49 = arith.mulf %17, %48 : vector<8x128xf32>
    %50 = arith.mulf %49, %49 : vector<8x128xf32>
    %cst_19 = arith.constant dense<0.000000e+00> : vector<8xf32>
    %51 = vector.multi_reduction <add>, %50, %cst_19 [1] : vector<8x128xf32> to vector<8xf32>
    %52 = vector.shape_cast %51 : vector<8xf32> to vector<8x1xf32>
    %cst_20 = arith.constant 1.000000e-24 : f32
    %53 = vector.broadcast %cst_20 : f32 to vector<8x1xf32>
    %54 = arith.maximumf %52, %53 : vector<8x1xf32>
    %55 = math.rsqrt %54 : vector<8x1xf32>
    %56 = vector.broadcast %55 : vector<8x1xf32> to vector<8x128xf32>
    %57 = arith.mulf %49, %56 : vector<8x128xf32>
    %c0_21 = arith.constant 0 : index
    %c0_22 = arith.constant 0 : index
    %c0_23 = arith.constant 0 : index
    %58 = vector.load %arg1[%c0_21, %c0_22, %c0_23] : memref<2x8x128xbf16, #tpu.memory_space<vmem>>, vector<1x8x128xbf16>
    %59 = vector.shape_cast %58 : vector<1x8x128xbf16> to vector<8x128xbf16>
    %60 = vector.extract_strided_slice %6 {offsets = [0, 0], sizes = [128, 128], strides = [1, 1]} : vector<256x128xbf16> to vector<128x128xbf16>
    %61 = vector.extract_strided_slice %6 {offsets = [128, 0], sizes = [128, 128], strides = [1, 1]} : vector<256x128xbf16> to vector<128x128xbf16>
    %c0_24 = arith.constant 0 : index
    %c0_25 = arith.constant 0 : index
    %c0_26 = arith.constant 0 : index
    %62 = vector.load %arg5[%c0_24, %c0_25, %c0_26] : memref<2x4x128xf32, #tpu.memory_space<vmem>>, vector<1x4x128xf32>
    %63 = vector.shape_cast %62 : vector<1x4x128xf32> to vector<4x128xf32>
    %64 = vector.extract_strided_slice %63 {offsets = [0, 0], sizes = [1, 128], strides = [1, 1]} : vector<4x128xf32> to vector<1x128xf32>
    %65 = vector.extract_strided_slice %63 {offsets = [1, 0], sizes = [1, 128], strides = [1, 1]} : vector<4x128xf32> to vector<1x128xf32>
    %66 = vector.extract_strided_slice %63 {offsets = [2, 0], sizes = [1, 128], strides = [1, 1]} : vector<4x128xf32> to vector<1x128xf32>
    %67 = vector.extract_strided_slice %63 {offsets = [3, 0], sizes = [1, 128], strides = [1, 1]} : vector<4x128xf32> to vector<1x128xf32>
    %cst_27 = arith.constant dense<0.000000e+00> : vector<8x128xf32>
    %68 = tpu.matmul %59, %60, %cst_27 {dimension_numbers = #tpu.dot_dimension_numbers<[1], [0], [0], [1], [0, 0, 1, 1], [], []>} : vector<8x128xbf16>, vector<128x128xbf16>, vector<8x128xf32> -> vector<8x128xf32>
    %69 = vector.broadcast %64 : vector<1x128xf32> to vector<8x128xf32>
    %70 = arith.addf %68, %69 : vector<8x128xf32>
    %71 = arith.truncf %70 : vector<8x128xf32> to vector<8x128xbf16>
    %cst_28 = arith.constant dense<0.000000e+00> : vector<8x128xf32>
    %72 = tpu.matmul %71, %61, %cst_28 {dimension_numbers = #tpu.dot_dimension_numbers<[1], [0], [0], [1], [0, 0, 1, 1], [], []>} : vector<8x128xbf16>, vector<128x128xbf16>, vector<8x128xf32> -> vector<8x128xf32>
    %73 = vector.broadcast %65 : vector<1x128xf32> to vector<8x128xf32>
    %74 = arith.addf %72, %73 : vector<8x128xf32>
    %cst_29 = arith.constant dense<0.000000e+00> : vector<128xf32>
    %75 = vector.multi_reduction <add>, %74, %cst_29 [0] : vector<8x128xf32> to vector<128xf32>
    %76 = vector.shape_cast %75 : vector<128xf32> to vector<1x128xf32>
    %cst_30 = arith.constant 8.000000e+00 : f32
    %77 = vector.broadcast %cst_30 : f32 to vector<1x128xf32>
    %78 = arith.divf %76, %77 : vector<1x128xf32>
    %79 = vector.broadcast %78 : vector<1x128xf32> to vector<8x128xf32>
    %80 = arith.subf %74, %79 : vector<8x128xf32>
    %81 = arith.mulf %80, %80 : vector<8x128xf32>
    %cst_31 = arith.constant dense<0.000000e+00> : vector<128xf32>
    %82 = vector.multi_reduction <add>, %81, %cst_31 [0] : vector<8x128xf32> to vector<128xf32>
    %83 = vector.shape_cast %82 : vector<128xf32> to vector<1x128xf32>
    %cst_32 = arith.constant 8.000000e+00 : f32
    %84 = vector.broadcast %cst_32 : f32 to vector<1x128xf32>
    %85 = arith.divf %83, %84 : vector<1x128xf32>
    %86 = vector.broadcast %78 : vector<1x128xf32> to vector<8x128xf32>
    %87 = arith.subf %74, %86 : vector<8x128xf32>
    %cst_33 = arith.constant 9.99999974E-6 : f32
    %88 = vector.broadcast %cst_33 : f32 to vector<1x128xf32>
    %89 = arith.addf %85, %88 : vector<1x128xf32>
    %90 = math.rsqrt %89 : vector<1x128xf32>
    %91 = vector.broadcast %90 : vector<1x128xf32> to vector<8x128xf32>
    %92 = arith.mulf %87, %91 : vector<8x128xf32>
    %93 = vector.broadcast %66 : vector<1x128xf32> to vector<8x128xf32>
    %94 = arith.mulf %92, %93 : vector<8x128xf32>
    %95 = vector.broadcast %67 : vector<1x128xf32> to vector<8x128xf32>
    %96 = arith.addf %94, %95 : vector<8x128xf32>
    %97 = arith.negf %96 : vector<8x128xf32>
    %98 = math.exp %97 : vector<8x128xf32>
    %cst_34 = arith.constant 1.000000e+00 : f32
    %99 = vector.broadcast %cst_34 : f32 to vector<8x128xf32>
    %100 = arith.addf %99, %98 : vector<8x128xf32>
    %101 = arith.divf %99, %100 : vector<8x128xf32>
    %102 = arith.mulf %70, %101 : vector<8x128xf32>
    %103 = arith.mulf %102, %102 : vector<8x128xf32>
    %cst_35 = arith.constant dense<0.000000e+00> : vector<8xf32>
    %104 = vector.multi_reduction <add>, %103, %cst_35 [1] : vector<8x128xf32> to vector<8xf32>
    %105 = vector.shape_cast %104 : vector<8xf32> to vector<8x1xf32>
    %cst_36 = arith.constant 1.000000e-24 : f32
    %106 = vector.broadcast %cst_36 : f32 to vector<8x1xf32>
    %107 = arith.maximumf %105, %106 : vector<8x1xf32>
    %108 = math.rsqrt %107 : vector<8x1xf32>
    %109 = vector.broadcast %108 : vector<8x1xf32> to vector<8x128xf32>
    %110 = arith.mulf %102, %109 : vector<8x128xf32>
    %111 = arith.truncf %57 : vector<8x128xf32> to vector<8x128xbf16>
    %112 = arith.truncf %110 : vector<8x128xf32> to vector<8x128xbf16>
    %cst_37 = arith.constant dense<0.000000e+00> : vector<8x8xf32>
    %113 = tpu.matmul %111, %112, %cst_37 {dimension_numbers = #tpu.dot_dimension_numbers<[1], [1], [0], [0], [0, 0, 1, 0], [], []>} : vector<8x128xbf16>, vector<8x128xbf16>, vector<8x8xf32> -> vector<8x8xf32>
    %c0_38 = arith.constant 0 : index
    %c0_39 = arith.constant 0 : index
    %c0_40 = arith.constant 0 : index
    %114 = vector.load %arg6[%c0_38, %c0_39, %c0_40] : memref<2x8x1xf32, #tpu.memory_space<vmem>>, vector<1x8x1xf32>
    %115 = vector.shape_cast %114 : vector<1x8x1xf32> to vector<8x1xf32>
    %c0_41 = arith.constant 0 : index
    %c0_42 = arith.constant 0 : index
    %c0_43 = arith.constant 0 : index
    %116 = vector.load %arg7[%c0_41, %c0_42, %c0_43] : memref<2x1x8xf32, #tpu.memory_space<vmem>>, vector<1x1x8xf32>
    %117 = vector.shape_cast %116 : vector<1x1x8xf32> to vector<1x8xf32>
    %118 = vector.broadcast %115 : vector<8x1xf32> to vector<8x8xf32>
    %119 = vector.broadcast %117 : vector<1x8xf32> to vector<8x8xf32>
    %120 = arith.mulf %118, %119 : vector<8x8xf32>
    %121 = arith.mulf %120, %113 : vector<8x8xf32>
    %122 = arith.addf %1, %121 : vector<8x8xf32>
    %123 = arith.addf %2, %120 : vector<8x8xf32>
    %c1 = arith.constant 1 : index
    %c0_44 = arith.constant 0 : index
    %c0_45 = arith.constant 0 : index
    %124 = vector.load %arg2[%c1, %c0_44, %c0_45] : memref<2x256x128xbf16, #tpu.memory_space<vmem>>, vector<1x256x128xbf16>
    %125 = vector.shape_cast %124 : vector<1x256x128xbf16> to vector<256x128xbf16>
    %c1_46 = arith.constant 1 : index
    %c0_47 = arith.constant 0 : index
    %c0_48 = arith.constant 0 : index
    %126 = vector.load %arg4[%c1_46, %c0_47, %c0_48] : memref<2x256x128xbf16, #tpu.memory_space<vmem>>, vector<1x256x128xbf16>
    %127 = vector.shape_cast %126 : vector<1x256x128xbf16> to vector<256x128xbf16>
    %128 = vector.extract_strided_slice %125 {offsets = [0, 0], sizes = [128, 128], strides = [1, 1]} : vector<256x128xbf16> to vector<128x128xbf16>
    %129 = vector.extract_strided_slice %125 {offsets = [128, 0], sizes = [128, 128], strides = [1, 1]} : vector<256x128xbf16> to vector<128x128xbf16>
    %c1_49 = arith.constant 1 : index
    %c0_50 = arith.constant 0 : index
    %c0_51 = arith.constant 0 : index
    %130 = vector.load %arg3[%c1_49, %c0_50, %c0_51] : memref<2x4x128xf32, #tpu.memory_space<vmem>>, vector<1x4x128xf32>
    %131 = vector.shape_cast %130 : vector<1x4x128xf32> to vector<4x128xf32>
    %132 = vector.extract_strided_slice %131 {offsets = [0, 0], sizes = [1, 128], strides = [1, 1]} : vector<4x128xf32> to vector<1x128xf32>
    %133 = vector.extract_strided_slice %131 {offsets = [1, 0], sizes = [1, 128], strides = [1, 1]} : vector<4x128xf32> to vector<1x128xf32>
    %134 = vector.extract_strided_slice %131 {offsets = [2, 0], sizes = [1, 128], strides = [1, 1]} : vector<4x128xf32> to vector<1x128xf32>
    %135 = vector.extract_strided_slice %131 {offsets = [3, 0], sizes = [1, 128], strides = [1, 1]} : vector<4x128xf32> to vector<1x128xf32>
    %cst_52 = arith.constant dense<0.000000e+00> : vector<8x128xf32>
    %136 = tpu.matmul %0, %128, %cst_52 {dimension_numbers = #tpu.dot_dimension_numbers<[1], [0], [0], [1], [0, 0, 1, 1], [], []>} : vector<8x128xbf16>, vector<128x128xbf16>, vector<8x128xf32> -> vector<8x128xf32>
    %137 = vector.broadcast %132 : vector<1x128xf32> to vector<8x128xf32>
    %138 = arith.addf %136, %137 : vector<8x128xf32>
    %139 = arith.truncf %138 : vector<8x128xf32> to vector<8x128xbf16>
    %cst_53 = arith.constant dense<0.000000e+00> : vector<8x128xf32>
    %140 = tpu.matmul %139, %129, %cst_53 {dimension_numbers = #tpu.dot_dimension_numbers<[1], [0], [0], [1], [0, 0, 1, 1], [], []>} : vector<8x128xbf16>, vector<128x128xbf16>, vector<8x128xf32> -> vector<8x128xf32>
    %141 = vector.broadcast %133 : vector<1x128xf32> to vector<8x128xf32>
    %142 = arith.addf %140, %141 : vector<8x128xf32>
    %cst_54 = arith.constant dense<0.000000e+00> : vector<128xf32>
    %143 = vector.multi_reduction <add>, %142, %cst_54 [0] : vector<8x128xf32> to vector<128xf32>
    %144 = vector.shape_cast %143 : vector<128xf32> to vector<1x128xf32>
    %cst_55 = arith.constant 8.000000e+00 : f32
    %145 = vector.broadcast %cst_55 : f32 to vector<1x128xf32>
    %146 = arith.divf %144, %145 : vector<1x128xf32>
    %147 = vector.broadcast %146 : vector<1x128xf32> to vector<8x128xf32>
    %148 = arith.subf %142, %147 : vector<8x128xf32>
    %149 = arith.mulf %148, %148 : vector<8x128xf32>
    %cst_56 = arith.constant dense<0.000000e+00> : vector<128xf32>
    %150 = vector.multi_reduction <add>, %149, %cst_56 [0] : vector<8x128xf32> to vector<128xf32>
    %151 = vector.shape_cast %150 : vector<128xf32> to vector<1x128xf32>
    %cst_57 = arith.constant 8.000000e+00 : f32
    %152 = vector.broadcast %cst_57 : f32 to vector<1x128xf32>
    %153 = arith.divf %151, %152 : vector<1x128xf32>
    %154 = vector.broadcast %146 : vector<1x128xf32> to vector<8x128xf32>
    %155 = arith.subf %142, %154 : vector<8x128xf32>
    %cst_58 = arith.constant 9.99999974E-6 : f32
    %156 = vector.broadcast %cst_58 : f32 to vector<1x128xf32>
    %157 = arith.addf %153, %156 : vector<1x128xf32>
    %158 = math.rsqrt %157 : vector<1x128xf32>
    %159 = vector.broadcast %158 : vector<1x128xf32> to vector<8x128xf32>
    %160 = arith.mulf %155, %159 : vector<8x128xf32>
    %161 = vector.broadcast %134 : vector<1x128xf32> to vector<8x128xf32>
    %162 = arith.mulf %160, %161 : vector<8x128xf32>
    %163 = vector.broadcast %135 : vector<1x128xf32> to vector<8x128xf32>
    %164 = arith.addf %162, %163 : vector<8x128xf32>
    %165 = arith.negf %164 : vector<8x128xf32>
    %166 = math.exp %165 : vector<8x128xf32>
    %cst_59 = arith.constant 1.000000e+00 : f32
    %167 = vector.broadcast %cst_59 : f32 to vector<8x128xf32>
    %168 = arith.addf %167, %166 : vector<8x128xf32>
    %169 = arith.divf %167, %168 : vector<8x128xf32>
    %170 = arith.mulf %138, %169 : vector<8x128xf32>
    %171 = arith.mulf %170, %170 : vector<8x128xf32>
    %cst_60 = arith.constant dense<0.000000e+00> : vector<8xf32>
    %172 = vector.multi_reduction <add>, %171, %cst_60 [1] : vector<8x128xf32> to vector<8xf32>
    %173 = vector.shape_cast %172 : vector<8xf32> to vector<8x1xf32>
    %cst_61 = arith.constant 1.000000e-24 : f32
    %174 = vector.broadcast %cst_61 : f32 to vector<8x1xf32>
    %175 = arith.maximumf %173, %174 : vector<8x1xf32>
    %176 = math.rsqrt %175 : vector<8x1xf32>
    %177 = vector.broadcast %176 : vector<8x1xf32> to vector<8x128xf32>
    %178 = arith.mulf %170, %177 : vector<8x128xf32>
    %c1_62 = arith.constant 1 : index
    %c0_63 = arith.constant 0 : index
    %c0_64 = arith.constant 0 : index
    %179 = vector.load %arg1[%c1_62, %c0_63, %c0_64] : memref<2x8x128xbf16, #tpu.memory_space<vmem>>, vector<1x8x128xbf16>
    %180 = vector.shape_cast %179 : vector<1x8x128xbf16> to vector<8x128xbf16>
    %181 = vector.extract_strided_slice %127 {offsets = [0, 0], sizes = [128, 128], strides = [1, 1]} : vector<256x128xbf16> to vector<128x128xbf16>
    %182 = vector.extract_strided_slice %127 {offsets = [128, 0], sizes = [128, 128], strides = [1, 1]} : vector<256x128xbf16> to vector<128x128xbf16>
    %c1_65 = arith.constant 1 : index
    %c0_66 = arith.constant 0 : index
    %c0_67 = arith.constant 0 : index
    %183 = vector.load %arg5[%c1_65, %c0_66, %c0_67] : memref<2x4x128xf32, #tpu.memory_space<vmem>>, vector<1x4x128xf32>
    %184 = vector.shape_cast %183 : vector<1x4x128xf32> to vector<4x128xf32>
    %185 = vector.extract_strided_slice %184 {offsets = [0, 0], sizes = [1, 128], strides = [1, 1]} : vector<4x128xf32> to vector<1x128xf32>
    %186 = vector.extract_strided_slice %184 {offsets = [1, 0], sizes = [1, 128], strides = [1, 1]} : vector<4x128xf32> to vector<1x128xf32>
    %187 = vector.extract_strided_slice %184 {offsets = [2, 0], sizes = [1, 128], strides = [1, 1]} : vector<4x128xf32> to vector<1x128xf32>
    %188 = vector.extract_strided_slice %184 {offsets = [3, 0], sizes = [1, 128], strides = [1, 1]} : vector<4x128xf32> to vector<1x128xf32>
    %cst_68 = arith.constant dense<0.000000e+00> : vector<8x128xf32>
    %189 = tpu.matmul %180, %181, %cst_68 {dimension_numbers = #tpu.dot_dimension_numbers<[1], [0], [0], [1], [0, 0, 1, 1], [], []>} : vector<8x128xbf16>, vector<128x128xbf16>, vector<8x128xf32> -> vector<8x128xf32>
    %190 = vector.broadcast %185 : vector<1x128xf32> to vector<8x128xf32>
    %191 = arith.addf %189, %190 : vector<8x128xf32>
    %192 = arith.truncf %191 : vector<8x128xf32> to vector<8x128xbf16>
    %cst_69 = arith.constant dense<0.000000e+00> : vector<8x128xf32>
    %193 = tpu.matmul %192, %182, %cst_69 {dimension_numbers = #tpu.dot_dimension_numbers<[1], [0], [0], [1], [0, 0, 1, 1], [], []>} : vector<8x128xbf16>, vector<128x128xbf16>, vector<8x128xf32> -> vector<8x128xf32>
    %194 = vector.broadcast %186 : vector<1x128xf32> to vector<8x128xf32>
    %195 = arith.addf %193, %194 : vector<8x128xf32>
    %cst_70 = arith.constant dense<0.000000e+00> : vector<128xf32>
    %196 = vector.multi_reduction <add>, %195, %cst_70 [0] : vector<8x128xf32> to vector<128xf32>
    %197 = vector.shape_cast %196 : vector<128xf32> to vector<1x128xf32>
    %cst_71 = arith.constant 8.000000e+00 : f32
    %198 = vector.broadcast %cst_71 : f32 to vector<1x128xf32>
    %199 = arith.divf %197, %198 : vector<1x128xf32>
    %200 = vector.broadcast %199 : vector<1x128xf32> to vector<8x128xf32>
    %201 = arith.subf %195, %200 : vector<8x128xf32>
    %202 = arith.mulf %201, %201 : vector<8x128xf32>
    %cst_72 = arith.constant dense<0.000000e+00> : vector<128xf32>
    %203 = vector.multi_reduction <add>, %202, %cst_72 [0] : vector<8x128xf32> to vector<128xf32>
    %204 = vector.shape_cast %203 : vector<128xf32> to vector<1x128xf32>
    %cst_73 = arith.constant 8.000000e+00 : f32
    %205 = vector.broadcast %cst_73 : f32 to vector<1x128xf32>
    %206 = arith.divf %204, %205 : vector<1x128xf32>
    %207 = vector.broadcast %199 : vector<1x128xf32> to vector<8x128xf32>
    %208 = arith.subf %195, %207 : vector<8x128xf32>
    %cst_74 = arith.constant 9.99999974E-6 : f32
    %209 = vector.broadcast %cst_74 : f32 to vector<1x128xf32>
    %210 = arith.addf %206, %209 : vector<1x128xf32>
    %211 = math.rsqrt %210 : vector<1x128xf32>
    %212 = vector.broadcast %211 : vector<1x128xf32> to vector<8x128xf32>
    %213 = arith.mulf %208, %212 : vector<8x128xf32>
    %214 = vector.broadcast %187 : vector<1x128xf32> to vector<8x128xf32>
    %215 = arith.mulf %213, %214 : vector<8x128xf32>
    %216 = vector.broadcast %188 : vector<1x128xf32> to vector<8x128xf32>
    %217 = arith.addf %215, %216 : vector<8x128xf32>
    %218 = arith.negf %217 : vector<8x128xf32>
    %219 = math.exp %218 : vector<8x128xf32>
    %cst_75 = arith.constant 1.000000e+00 : f32
    %220 = vector.broadcast %cst_75 : f32 to vector<8x128xf32>
    %221 = arith.addf %220, %219 : vector<8x128xf32>
    %222 = arith.divf %220, %221 : vector<8x128xf32>
    %223 = arith.mulf %191, %222 : vector<8x128xf32>
    %224 = arith.mulf %223, %223 : vector<8x128xf32>
    %cst_76 = arith.constant dense<0.000000e+00> : vector<8xf32>
    %225 = vector.multi_reduction <add>, %224, %cst_76 [1] : vector<8x128xf32> to vector<8xf32>
    %226 = vector.shape_cast %225 : vector<8xf32> to vector<8x1xf32>
    %cst_77 = arith.constant 1.000000e-24 : f32
    %227 = vector.broadcast %cst_77 : f32 to vector<8x1xf32>
    %228 = arith.maximumf %226, %227 : vector<8x1xf32>
    %229 = math.rsqrt %228 : vector<8x1xf32>
    %230 = vector.broadcast %229 : vector<8x1xf32> to vector<8x128xf32>
    %231 = arith.mulf %223, %230 : vector<8x128xf32>
    %232 = arith.truncf %178 : vector<8x128xf32> to vector<8x128xbf16>
    %233 = arith.truncf %231 : vector<8x128xf32> to vector<8x128xbf16>
    %cst_78 = arith.constant dense<0.000000e+00> : vector<8x8xf32>
    %234 = tpu.matmul %232, %233, %cst_78 {dimension_numbers = #tpu.dot_dimension_numbers<[1], [1], [0], [0], [0, 0, 1, 0], [], []>} : vector<8x128xbf16>, vector<8x128xbf16>, vector<8x8xf32> -> vector<8x8xf32>
    %c1_79 = arith.constant 1 : index
    %c0_80 = arith.constant 0 : index
    %c0_81 = arith.constant 0 : index
    %235 = vector.load %arg6[%c1_79, %c0_80, %c0_81] : memref<2x8x1xf32, #tpu.memory_space<vmem>>, vector<1x8x1xf32>
    %236 = vector.shape_cast %235 : vector<1x8x1xf32> to vector<8x1xf32>
    %c1_82 = arith.constant 1 : index
    %c0_83 = arith.constant 0 : index
    %c0_84 = arith.constant 0 : index
    %237 = vector.load %arg7[%c1_82, %c0_83, %c0_84] : memref<2x1x8xf32, #tpu.memory_space<vmem>>, vector<1x1x8xf32>
    %238 = vector.shape_cast %237 : vector<1x1x8xf32> to vector<1x8xf32>
    %239 = vector.broadcast %236 : vector<8x1xf32> to vector<8x8xf32>
    %240 = vector.broadcast %238 : vector<1x8xf32> to vector<8x8xf32>
    %241 = arith.mulf %239, %240 : vector<8x8xf32>
    %242 = arith.mulf %241, %234 : vector<8x8xf32>
    %243 = arith.addf %122, %242 : vector<8x8xf32>
    %244 = arith.addf %123, %241 : vector<8x8xf32>
    %cst_85 = arith.constant 9.99999996E-13 : f32
    %245 = vector.broadcast %cst_85 : f32 to vector<8x8xf32>
    %246 = arith.maximumf %244, %245 : vector<8x8xf32>
    %247 = arith.divf %243, %246 : vector<8x8xf32>
    %c0_86 = arith.constant 0 : index
    %c0_87 = arith.constant 0 : index
    %248 = vector.load %arg8[%c0_86, %c0_87] : memref<8x8xf32, #tpu.memory_space<vmem>>, vector<8x8xf32>
    tpu.vector_store %arg8[%c0_86, %c0_87], %247 {strides = array<i32>} : memref<8x8xf32, #tpu.memory_space<vmem>>, vector<8x8xf32>,
    return
  }
}

</mosaic_0001>

<bundles_post_ra>
// kernel: _lambda_.1
= control target key start
LH: loop header
LB: loop body
LE: loop exit
PB: predicated region body
PF: predicated region fallthrough
CT: control target
= control target key end

     0   :  { %13 = vsyncpa [#allocation3], 0  ;;  %s2333_s0 = inlined_call_operand.hbm [shape: bf16[8,128], index: 0, kind: input, shape index: {}]   ;;  %s2334_s1 = inlined_call_operand.hbm [shape: bf16[2,8,128], index: 1, kind: input, shape index: {}]   ;;  %s2335_s2 = inlined_call_operand.hbm [shape: bf16[2,256,128], index: 2, kind: input, shape index: {}]   ;;  %s2336_s3 = inlined_call_operand.hbm [shape: f32[2,4,128], index: 3, kind: input, shape index: {}]   ;;  %s2337_s4 = inlined_call_operand.hbm [shape: bf16[2,256,128], index: 4, kind: input, shape index: {}]   ;;  %s2338_s5 = inlined_call_operand.hbm [shape: f32[2,4,128], index: 5, kind: input, shape index: {}]   ;;  %s2339_s6 = inlined_call_operand.hbm [shape: f32[2,8,1], index: 6, kind: input, shape index: {}]   ;;  %s2340_s7 = inlined_call_operand.hbm [shape: f32[2,1,8], index: 7, kind: input, shape index: {}]   ;;  %s2341_s8 = inlined_call_operand.hbm [shape: f32[8,8], index: 8, kind: output, shape index: {}]  }
   0x1   :  { %14 = vsyncpa [#allocation6], 0 }
   0x2   :  { %15 = vsyncpa [#allocation9], 0 }
   0x3   :  { %16 = vsyncpa [#allocation12], 0 }
   0x4   :  { %17 = vsyncpa [#allocation15], 0 }
   0x5   :  { %18 = vsyncpa [#allocation4], 0  ;;  %s1977_s27 = smov [#allocation5]   ;;  %s1767_s9 = scalar_lea.hbm %s2334_s1, 128 }
   0x6   :  { %s34_s28 = sshll.u32 %s1977_s27, 4  ;;  %p1768_p0 = scmp.ne.s32.totalorder %s2334_s1, %s1767_s9  ;;  %s35_s28 = int_to_ptr.vmem [resolvable:$true] %s34_s28 }
   0x7   :  { %p1771_p1 = scmp.lt.u32.totalorder %s1767_s9, %s2334_s1 }
   0x9   :  { %p1773_p2 = pnand %p1771_p1, %p1768_p0 }
   0xb   :  { %1776 = shalt.err (!%p1773_p2)
}
   0xc   :  { %s1777_s14 = scalar_lea.vmem %s35_s28, 128  ;;  %p1782_p4 = scmp.lt.s32.totalorder %s35_s28, %s35_s28 }
   0xd   :  { %p1778_p3 = scmp.ne.s32.totalorder %s35_s28, %s1777_s14  ;;  %p1783_p5 = scmp.lt.s32.totalorder %s1777_s14, %s1777_s14 }
   0xf   :  { %p1784_p6 = por %p1783_p5, %p1782_p4 }
  0x11   :  { %p1785_p7 = pnand %p1784_p6, %p1778_p3 }
  0x13   :  { %1788 = shalt.err (!%p1785_p7)
}
  0x14   :  { %s1978_s15 = smov 64   ;;  %s1979_s16 = smov 4  }
  0x15   :  { %40 = dma.hbm_to_vmem [thread:$0]  %s2334_s1, 128, %s35_s28, [#allocation6], %s1978_s15, %s1978_s15, %s1979_s16  }
  0x16   :  { %s1980_s19 = smov [#allocation8]   ;;  %s1981_s21 = smov [#allocation11]  }
  0x17   :  { %s58_s20 = sshll.u32 %s1980_s19, 4  ;;  %s82_s22 = sshll.u32 %s1981_s21, 4  ;;  %s59_s20 = int_to_ptr.vmem [resolvable:$true] %s58_s20  ;;  %s83_s22 = int_to_ptr.vmem [resolvable:$true] %s82_s22 }
  0x18   :  { %s1789_s25 = scalar_lea.hbm %s2336_s3, 128 }
  0x19   :  { %p1790_p8 = scmp.ne.s32.totalorder %s2336_s3, %s1789_s25  ;;  %p1793_p9 = scmp.lt.u32.totalorder %s1789_s25, %s2336_s3 }
  0x1b   :  { %p1795_p10 = pnand %p1793_p9, %p1790_p8 }
  0x1d   :  { %1798 = shalt.err (!%p1795_p10)
}
  0x1e   :  { %s1799_s1 = scalar_lea.vmem %s59_s20, 128  ;;  %p1804_p12 = scmp.lt.s32.totalorder %s59_s20, %s59_s20 }
  0x1f   :  { %p1800_p11 = scmp.ne.s32.totalorder %s59_s20, %s1799_s1  ;;  %p1805_p13 = scmp.lt.s32.totalorder %s1799_s1, %s1799_s1 }
  0x21   :  { %p1806_p0 = por %p1805_p13, %p1804_p12 }
  0x23   :  { %p1807_p1 = pnand %p1806_p0, %p1800_p11 }
  0x25   :  { %1810 = shalt.err (!%p1807_p1)
}
  0x26   :  { %64 = dma.hbm_to_vmem [thread:$0]  %s2336_s3, 128, %s59_s20, [#allocation9], %s1978_s15, %s1978_s15, %s1979_s16  }
  0x27   :  { %s1811_s12 = scalar_lea.hbm %s2338_s5, 128 }
  0x28   :  { %p1812_p2 = scmp.ne.s32.totalorder %s2338_s5, %s1811_s12  ;;  %p1815_p3 = scmp.lt.u32.totalorder %s1811_s12, %s2338_s5 }
  0x2a   :  { %p1817_p4 = pnand %p1815_p3, %p1812_p2 }
  0x2c   :  { %1820 = shalt.err (!%p1817_p4)
}
  0x2d   :  { %s1821_s19 = scalar_lea.vmem %s83_s22, 128  ;;  %p1826_p6 = scmp.lt.s32.totalorder %s83_s22, %s83_s22 }
  0x2e   :  { %p1822_p5 = scmp.ne.s32.totalorder %s83_s22, %s1821_s19  ;;  %p1827_p7 = scmp.lt.s32.totalorder %s1821_s19, %s1821_s19 }
  0x30   :  { %p1828_p8 = por %p1827_p7, %p1826_p6 }
  0x32   :  { %p1829_p9 = pnand %p1828_p8, %p1822_p5 }
  0x34   :  { %1832 = shalt.err (!%p1829_p9)
}
  0x35   :  { %88 = dma.hbm_to_vmem [thread:$0]  %s2338_s5, 128, %s83_s22, [#allocation12], %s1978_s15, %s1978_s15, %s1979_s16  }
  0x36   :  { %s1982_s21 = smov [#allocation2]   ;;  %s1983_s24 = smov [#allocation7]  }
  0x37   :  { %s25_s23 = sshll.u32 %s1982_s21, 4  ;;  %s46_s25 = sshll.u32 %s1983_s24, 4  ;;  %s26_s23 = int_to_ptr.vmem [resolvable:$true] %s25_s23  ;;  %s47_s25 = int_to_ptr.vmem [resolvable:$true] %s46_s25 }
  0x38   :  { %s1833_s29 = scalar_lea.hbm %s2333_s0, 64 }
  0x39   :  { %p1834_p10 = scmp.ne.s32.totalorder %s2333_s0, %s1833_s29  ;;  %p1837_p11 = scmp.lt.u32.totalorder %s1833_s29, %s2333_s0 }
  0x3b   :  { %p1839_p12 = pnand %p1837_p11, %p1834_p10 }
  0x3d   :  { %1842 = shalt.err (!%p1839_p12)
}
  0x3e   :  { %s1843_s5 = scalar_lea.vmem %s26_s23, 64  ;;  %p1848_p0 = scmp.lt.s32.totalorder %s26_s23, %s26_s23 }
  0x3f   :  { %p1844_p13 = scmp.ne.s32.totalorder %s26_s23, %s1843_s5  ;;  %p1849_p1 = scmp.lt.s32.totalorder %s1843_s5, %s1843_s5 }
  0x41   :  { %p1850_p2 = por %p1849_p1, %p1848_p0 }
  0x43   :  { %p1851_p3 = pnand %p1850_p2, %p1844_p13 }
  0x45   :  { %1854 = shalt.err (!%p1851_p3)
}
  0x46   :  { %28 = dma.hbm_to_vmem [thread:$0]  %s2333_s0, 64, %s26_s23, [#allocation3]  }
  0x47   :  { %s1855_s13 = scalar_lea.hbm %s2335_s2, 4096 }
  0x48   :  { %p1856_p4 = scmp.ne.s32.totalorder %s2335_s2, %s1855_s13  ;;  %p1859_p5 = scmp.lt.u32.totalorder %s1855_s13, %s2335_s2 }
  0x4a   :  { %p1861_p6 = pnand %p1859_p5, %p1856_p4 }
  0x4c   :  { %1864 = shalt.err (!%p1861_p6)
}
  0x4d   :  { %s1865_s3 = scalar_lea.vmem %s47_s25, 4096  ;;  %p1870_p8 = scmp.lt.s32.totalorder %s47_s25, %s47_s25 }
  0x4e   :  { %p1866_p7 = scmp.ne.s32.totalorder %s47_s25, %s1865_s3  ;;  %p1871_p9 = scmp.lt.s32.totalorder %s1865_s3, %s1865_s3 }
  0x50   :  { %p1872_p10 = por %p1871_p9, %p1870_p8 }
  0x52   :  { %p1873_p11 = pnand %p1872_p10, %p1866_p7 }
  0x54   :  { %1876 = shalt.err (!%p1873_p11)
}
  0x55   :  { %52 = dma.hbm_to_vmem [thread:$0]  %s2335_s2, 4096, %s47_s25, [#allocation6], %s1978_s15, %s1978_s15, %s1979_s16  }
  0x56   :  { %s1984_s21 = smov [#allocation10]   ;;  %s1985_s24 = smov [#allocation13]  }
  0x57   :  { %s70_s23 = sshll.u32 %s1984_s21, 4  ;;  %s94_s26 = sshll.u32 %s1985_s24, 4  ;;  %s71_s23 = int_to_ptr.vmem [resolvable:$true] %s70_s23  ;;  %s95_s26 = int_to_ptr.vmem [resolvable:$true] %s94_s26 }
  0x58   :  { %s1877_s30 = scalar_lea.hbm %s2337_s4, 4096 }
  0x59   :  { %p1878_p12 = scmp.ne.s32.totalorder %s2337_s4, %s1877_s30  ;;  %p1881_p13 = scmp.lt.u32.totalorder %s1877_s30, %s2337_s4 }
  0x5b   :  { %p1883_p0 = pnand %p1881_p13, %p1878_p12 }
  0x5d   :  { %1886 = shalt.err (!%p1883_p0)
}
  0x5e   :  { %s1887_s2 = scalar_lea.vmem %s71_s23, 4096  ;;  %p1892_p2 = scmp.lt.s32.totalorder %s71_s23, %s71_s23 }
  0x5f   :  { %p1888_p1 = scmp.ne.s32.totalorder %s71_s23, %s1887_s2  ;;  %p1893_p3 = scmp.lt.s32.totalorder %s1887_s2, %s1887_s2 }
  0x61   :  { %p1894_p4 = por %p1893_p3, %p1892_p2 }
  0x63   :  { %p1895_p5 = pnand %p1894_p4, %p1888_p1 }
  0x65   :  { %1898 = shalt.err (!%p1895_p5)
}
  0x66   :  { %76 = dma.hbm_to_vmem [thread:$0]  %s2337_s4, 4096, %s71_s23, [#allocation9], %s1978_s15, %s1978_s15, %s1979_s16  }
  0x67   :  { %s1899_s12 = scalar_lea.hbm %s2339_s6, 256 }
  0x68   :  { %p1900_p6 = scmp.ne.s32.totalorder %s2339_s6, %s1899_s12  ;;  %p1903_p7 = scmp.lt.u32.totalorder %s1899_s12, %s2339_s6 }
  0x6a   :  { %p1905_p8 = pnand %p1903_p7, %p1900_p6 }
  0x6c   :  { %1908 = shalt.err (!%p1905_p8)
}
  0x6d   :  { %s1909_s19 = scalar_lea.vmem %s95_s26, 256  ;;  %p1914_p10 = scmp.lt.s32.totalorder %s95_s26, %s95_s26 }
  0x6e   :  { %p1910_p9 = scmp.ne.s32.totalorder %s95_s26, %s1909_s19  ;;  %p1915_p11 = scmp.lt.s32.totalorder %s1909_s19, %s1909_s19 }
  0x70   :  { %p1916_p12 = por %p1915_p11, %p1914_p10 }
  0x72   :  { %p1917_p13 = pnand %p1916_p12, %p1910_p9 }
  0x74   :  { %1920 = shalt.err (!%p1917_p13)
}
  0x75   :  { %s1986_s4 = smov 128   ;;  %s1987_s15 = smov 8  }
  0x76   :  { %100 = dma.hbm_to_vmem [thread:$0]  %s2339_s6, 256, %s95_s26, [#allocation12], %s1986_s4, %s1986_s4, %s1987_s15  }
  0x77   :  { %s1988_s0 = smov [#allocation14]   ;;  %s1921_s24 = scalar_lea.hbm %s2340_s7, 32 }
  0x78   :  { %s106_s20 = sshll.u32 %s1988_s0, 4  ;;  %p1922_p0 = scmp.ne.s32.totalorder %s2340_s7, %s1921_s24  ;;  %s107_s20 = int_to_ptr.vmem [resolvable:$true] %s106_s20 }
  0x79   :  { %p1925_p1 = scmp.lt.u32.totalorder %s1921_s24, %s2340_s7 }
  0x7b   :  { %p1927_p2 = pnand %p1925_p1, %p1922_p0 }
  0x7d   :  { %1930 = shalt.err (!%p1927_p2)
}
  0x7e   :  { %s1931_s28 = scalar_lea.vmem %s107_s20, 32  ;;  %p1936_p4 = scmp.lt.s32.totalorder %s107_s20, %s107_s20 }
  0x7f   :  { %p1932_p3 = scmp.ne.s32.totalorder %s107_s20, %s1931_s28  ;;  %p1937_p5 = scmp.lt.s32.totalorder %s1931_s28, %s1931_s28 }
  0x81   :  { %p1938_p6 = por %p1937_p5, %p1936_p4 }
  0x83   :  { %p1939_p7 = pnand %p1938_p6, %p1932_p3 }
  0x85   :  { %1942 = shalt.err (!%p1939_p7)
}
  0x86   :  { %s1989_s6 = smov 16   ;;  %s1990_s26 = smov 1  }
  0x87   :  { %112 = dma.hbm_to_vmem [thread:$0]  %s2340_s7, 32, %s107_s20, [#allocation15], %s1989_s6, %s1989_s6, %s1990_s26  }
  0x88   :  { %1965 = dma.done.wait [#allocation3], 64  }
  0x89   :  { %1966 = vsyncadd [#allocation3], 4294967232 }
  0x8a   :  { %1967 = dma.done.wait [#allocation6], 4224  }
  0x8b   :  { %1968 = vsyncadd [#allocation6], 4294963072 }
  0x8c   :  { %1969 = dma.done.wait [#allocation9], 4224  }
  0x8d   :  { %1970 = vsyncadd [#allocation9], 4294963072 }
  0x8e   :  { %1971 = dma.done.wait [#allocation12], 384  }
  0x8f   :  { %1972 = vsyncadd [#allocation12], 4294966912 }
  0x90   :  { %1973 = dma.done.wait [#allocation15], 32  }
  0x91   :  { %1974 = vsyncadd [#allocation15], 4294967264  ;;  %v1991_v0 = vmov 0.0   ;;  %vm1992_vm0 = vmmov 0   ;;  %v1669_v1 = vld [vmem:[#allocation7] sm:$0xff]   ;;  %v1670_v2 = vld [vmem:[#allocation7 + $0x8] sm:$0xff]   ;;  %v204_v27 = vlaneseq }
  0x92   :  { %1477 = vmatprep.subr.bf16.mxu0 %v1991_v0  ;;  %1493 = vmatprep.mubr.msk.bf16.mxu0 %vm1992_vm0, %v1991_v0  ;;  %v1671_v3 = vld [vmem:[#allocation7 + $0x10] sm:$0xff]   ;;  %v1672_v4 = vld [vmem:[#allocation7 + $0x18] sm:$0xff]   ;;  %v1673_v5 = vld [vmem:[#allocation7 + $0x20] sm:$0xff]   ;;  %s1994_s7 = smov [#allocation16]   ;;  %vm1310_vm1 = vcmask 64512  }
  0x93   :  { %1497 = vmatprep.subr.bf16.mxu1 %v1991_v0  ;;  %1513 = vmatprep.mubr.msk.bf16.mxu1 %vm1992_vm0, %v1991_v0  ;;  %v1685_v6 = vld [vmem:[#allocation7 + $0x40] sm:$0xff]   ;;  %v1674_v7 = vld [vmem:[#allocation7 + $0x28] sm:$0xff]   ;;  %v1675_v9 = vld [vmem:[#allocation7 + $0x30] sm:$0xff]   ;;  %v2188_v28 = vshrl.u32 %v204_v27, 7  ;;  %s1318_s2 = sshll.u32 %s1994_s7, 4  ;;  %s1319_s2 = int_to_ptr.vmem [resolvable:$true] %s1318_s2 }
  0x94   :  { %1478 = vmatpush3.bf16.msra.mxu0 %v1669_v1  ;;  %1498 = vmatpush3.bf16.msra.mxu1 %v1685_v6  ;;  %v1686_v8 = vld [vmem:[#allocation7 + $0x48] sm:$0xff]   ;;  %v1687_v10 = vld [vmem:[#allocation7 + $0x50] sm:$0xff]   ;;  %v1676_v11 = vld [vmem:[#allocation7 + $0x38] sm:$0xff]   ;;  %s1943_s25 = scalar_lea.vmem %s1319_s2, 128  ;;  %p1948_p9 = scmp.lt.s32.totalorder %s1319_s2, %s1319_s2 }
  0x95   :  { %1479 = vmatprep.subr.bf16.mxu0 %v1991_v0  ;;  %1499 = vmatprep.subr.bf16.mxu1 %v1991_v0  ;;  %v1688_v12 = vld [vmem:[#allocation7 + $0x58] sm:$0xff]   ;;  %v2166_v13 = vld [vmem:[#allocation2] sm:$0xf]  ;;  %v1677_v14 = vld [vmem:[#allocation10] sm:$0xff]   ;;  %v2191_v29 = vsub.s32 0, %v2188_v28  ;;  %p1944_p8 = scmp.ne.s32.totalorder %s1319_s2, %s1943_s25  ;;  %p1949_p10 = scmp.lt.s32.totalorder %s1943_s25, %s1943_s25 }
  0x96   :  { %v1689_v15 = vld [vmem:[#allocation7 + $0x60] sm:$0xff]   ;;  %v1678_v16 = vld [vmem:[#allocation10 + $0x8] sm:$0xff]   ;;  %v1690_v17 = vld [vmem:[#allocation7 + $0x68] sm:$0xff]  }
  0x97   :  { %v1679_v18 = vld [vmem:[#allocation10 + $0x10] sm:$0xff]   ;;  %v1691_v19 = vld [vmem:[#allocation7 + $0x70] sm:$0xff]   ;;  %v1680_v20 = vld [vmem:[#allocation10 + $0x18] sm:$0xff]   ;;  %p1950_p11 = por %p1949_p10, %p1948_p9 }
  0x98   :  { %1480 = vmatpush3.bf16.msra.mxu0 %v1670_v2  ;;  %1500 = vmatpush3.bf16.msra.mxu1 %v1686_v8  ;;  %v1681_v21 = vld [vmem:[#allocation10 + $0x20] sm:$0xff]   ;;  %v1682_v22 = vld [vmem:[#allocation10 + $0x28] sm:$0xff]   ;;  %v1683_v23 = vld [vmem:[#allocation10 + $0x30] sm:$0xff]  }
  0x99   :  { %1481 = vmatprep.subr.bf16.mxu0 %v1991_v0  ;;  %1501 = vmatprep.subr.bf16.mxu1 %v1991_v0  ;;  %v1684_v24 = vld [vmem:[#allocation10 + $0x38] sm:$0xff]   ;;  %v432_v25 = vld [vmem:[#allocation5] sm:$0xf]  ;;  %v1693_v36 = vld [vmem:[#allocation10 + $0x40] sm:$0xff]   ;;  %p1951_p12 = pnand %p1950_p11, %p1944_p8 }
  0x9a   :  { %v1692_v26 = vld [vmem:[#allocation7 + $0x78] sm:$0xff]   ;;  %v2193_v30 = vld [vmem:[#allocation8] sm:$0xf]  ;;  %v1694_v39 = vld [vmem:[#allocation10 + $0x48] sm:$0xff]  }
  0x9b   :  { %v207_v31 = vrot.slane %v2193_v30, %v2191_v29  ;;  %v1695_v40 = vld [vmem:[#allocation10 + $0x50] sm:$0xff]   ;;  %v1696_v41 = vld [vmem:[#allocation10 + $0x58] sm:$0xff]   ;;  %v1697_v42 = vld [vmem:[#allocation10 + $0x60] sm:$0xff]  }
  0x9c   :  { %1482 = vmatpush3.bf16.msra.mxu0 %v1671_v3  ;;  %1502 = vmatpush3.bf16.msra.mxu1 %v1687_v10  ;;  %v1698_v43 = vld [vmem:[#allocation10 + $0x68] sm:$0xff]   ;;  %v1699_v44 = vld [vmem:[#allocation10 + $0x70] sm:$0xff]   ;;  %v2208_v45 = vld [vmem:[#allocation11] sm:$0xf] }
  0x9d   :  { %1483 = vmatprep.subr.bf16.mxu0 %v1991_v0  ;;  %1503 = vmatprep.subr.bf16.mxu1 %v1991_v0  ;;  %v437_v46 = vrot.slane %v2208_v45, %v2191_v29  ;;  %v1700_v47 = vld [vmem:[#allocation10 + $0x78] sm:$0xff]   ;;  %v1702_v55 = vld [vmem:[#allocation7 + $0x88] sm:$0xff]   ;;  %v1703_v56 = vld [vmem:[#allocation7 + $0x90] sm:$0xff]  }
  0x9e   :  { %v1701_v54 = vld [vmem:[#allocation7 + $0x80] sm:$0xff]   ;;  %v1704_v57 = vld [vmem:[#allocation7 + $0x98] sm:$0xff]   ;;  %v1706_v59 = vld [vmem:[#allocation7 + $0xa8] sm:$0xff]  }
  0x9f   :  { %v1705_v58 = vld [vmem:[#allocation7 + $0xa0] sm:$0xff]   ;;  %v1707_v60 = vld [vmem:[#allocation7 + $0xb0] sm:$0xff]   ;;  %v1708_v61 = vld [vmem:[#allocation7 + $0xb8] sm:$0xff]  }
  0xa0   :  { %1484 = vmatpush3.bf16.msra.mxu0 %v1672_v4  ;;  %1504 = vmatpush3.bf16.msra.mxu1 %v1688_v12  ;;  %v1709_v62 = vld [vmem:[#allocation10 + $0x80] sm:$0xff]   ;;  %v1710_v63 = vld [vmem:[#allocation10 + $0x88] sm:$0xff]   ;;  %v1711_v1 = vld [vmem:[#allocation10 + $0x90] sm:$0xff]  }
  0xa1   :  { %1485 = vmatprep.subr.bf16.mxu0 %v1991_v0  ;;  %1505 = vmatprep.subr.bf16.mxu1 %v1991_v0  ;;  %v1712_v2 = vld [vmem:[#allocation10 + $0x98] sm:$0xff]   ;;  %v1713_v3 = vld [vmem:[#allocation10 + $0xa0] sm:$0xff]   ;;  %v1714_v4 = vld [vmem:[#allocation10 + $0xa8] sm:$0xff]  }
  0xa2   :  { %v1716_v6 = vld [vmem:[#allocation10 + $0xb8] sm:$0xff]   ;;  %v1016_v8 = vld [vmem:[#allocation5 + $0x4] sm:$0xf] }
  0xa4   :  { %1486 = vmatpush3.bf16.msra.mxu0 %v1673_v5  ;;  %1506 = vmatpush3.bf16.msra.mxu1 %v1689_v15  ;;  %v1715_v5 = vld [vmem:[#allocation10 + $0xb0] sm:$0xff]  }
  0xa5   :  { %1487 = vmatprep.subr.bf16.mxu0 %v1991_v0  ;;  %1507 = vmatprep.subr.bf16.mxu1 %v1991_v0 }
  0xa8   :  { %1488 = vmatpush3.bf16.msra.mxu0 %v1674_v7  ;;  %1508 = vmatpush3.bf16.msra.mxu1 %v1690_v17  ;;  %v2239_v7 = vsub.s32 1, %v2188_v28 }
  0xa9   :  { %1489 = vmatprep.subr.bf16.mxu0 %v1991_v0  ;;  %1509 = vmatprep.subr.bf16.mxu1 %v1991_v0 }
  0xac   :  { %1490 = vmatpush3.bf16.msra.mxu0 %v1675_v9  ;;  %1510 = vmatpush3.bf16.msra.mxu1 %v1691_v19  ;;  %v300_v9 = vrot.slane %v2193_v30, %v2239_v7 }
  0xad   :  { %1491 = vmatprep.subr.bf16.mxu0 %v1991_v0  ;;  %1511 = vmatprep.subr.bf16.mxu1 %v1991_v0 }
  0xb0   :  { %1492 = vmatpush3.bf16.msra.mxu0 %v1676_v11  ;;  %1512 = vmatpush3.bf16.msra.mxu1 %v1692_v26  ;;  %v530_v26 = vrot.slane %v2208_v45, %v2239_v7 }
  0xb1   :  { %1517 = vmatprep.subr.bf16.mxu0 %v1991_v0  ;;  %1537 = vmatprep.subr.bf16.mxu1 %v1991_v0 }
  0xb3   :  { %1494 = vmatmul.mubr.bf16.vlgmr.msra.gmra.mrb[0].mxu0 %v2166_v13 }
  0xb4   :  { %1518 = vmatpush3.bf16.msra.mxu0 %v1677_v14  ;;  %1533 = vmatprep.mubr.msk.bf16.mxu0 %vm1992_vm0, %v1991_v0 }
  0xb5   :  { %1519 = vmatprep.subr.bf16.mxu0 %v1991_v0 }
  0xb8   :  { %1520 = vmatpush3.bf16.msra.mxu0 %v1678_v16 }
  0xb9   :  { %1521 = vmatprep.subr.bf16.mxu0 %v1991_v0 }
  0xbc   :  { %1522 = vmatpush3.bf16.msra.mxu0 %v1679_v18 }
  0xbd   :  { %1523 = vmatprep.subr.bf16.mxu0 %v1991_v0 }
  0xc0   :  { %1524 = vmatpush3.bf16.msra.mxu0 %v1680_v20 }
  0xc1   :  { %1525 = vmatprep.subr.bf16.mxu0 %v1991_v0 }
  0xc4   :  { %1526 = vmatpush3.bf16.msra.mxu0 %v1681_v21 }
  0xc5   :  { %1527 = vmatprep.subr.bf16.mxu0 %v1991_v0 }
  0xc8   :  { %1528 = vmatpush3.bf16.msra.mxu0 %v1682_v22 }
  0xc9   :  { %1529 = vmatprep.subr.bf16.mxu0 %v1991_v0 }
  0xcc   :  { %1530 = vmatpush3.bf16.msra.mxu0 %v1683_v23 }
  0xcd   :  { %1531 = vmatprep.subr.bf16.mxu0 %v1991_v0 }
  0xd0   :  { %1532 = vmatpush3.bf16.msra.mxu0 %v1684_v24 }
  0xd1   :  { %1557 = vmatprep.subr.bf16.mxu0 %v1991_v0 }
  0xd3   :  { %1534 = vmatmul.mubr.bf16.vlgmr.msra.gmra.mrb[4].mxu0 %v432_v25 }
  0xd4   :  { %1559 = vmatprep.mubr.msk.bf16.mxu0 %vm1992_vm0, %v1991_v0 }
 0x186   :  { %v290_v32 = vpop.f32.mrb[0].mxu0 }
 0x187   :  { %v2197_v33 = vadd.f32 %v290_v32, %v207_v31  ;;  %v1495_v34 = vpop.f32.mrb[1].mxu0 }
 0x188   :  { %v293_v35 = vpop.f32.mrb[2].mxu0 }
 0x189   :  { %v296_v37 = vpack.c.bf16 %v2197_v33, %v2197_v33  ;;  %v1496_v38 = vpop.f32.mrb[3].mxu0 }
 0x18b   :  { %1514 = vmatmul.mubr.bf16.vlgmr.msra.gmra.mrb[0].mxu1 %v296_v37 }
 0x18c   :  { %1538 = vmatpush3.bf16.msra.mxu1 %v1693_v36  ;;  %1553 = vmatprep.mubr.msk.bf16.mxu1 %vm1992_vm0, %v1991_v0 }
 0x18d   :  { %1539 = vmatprep.subr.bf16.mxu1 %v1991_v0 }
 0x190   :  { %1540 = vmatpush3.bf16.msra.mxu1 %v1694_v39 }
 0x191   :  { %1541 = vmatprep.subr.bf16.mxu1 %v1991_v0 }
 0x194   :  { %1542 = vmatpush3.bf16.msra.mxu1 %v1695_v40 }
 0x195   :  { %1543 = vmatprep.subr.bf16.mxu1 %v1991_v0 }
 0x198   :  { %1544 = vmatpush3.bf16.msra.mxu1 %v1696_v41 }
 0x199   :  { %1545 = vmatprep.subr.bf16.mxu1 %v1991_v0 }
 0x19c   :  { %1546 = vmatpush3.bf16.msra.mxu1 %v1697_v42 }
 0x19d   :  { %1547 = vmatprep.subr.bf16.mxu1 %v1991_v0 }
 0x1a0   :  { %1548 = vmatpush3.bf16.msra.mxu1 %v1698_v43 }
 0x1a1   :  { %1549 = vmatprep.subr.bf16.mxu1 %v1991_v0 }
 0x1a4   :  { %1550 = vmatpush3.bf16.msra.mxu1 %v1699_v44 }
 0x1a5   :  { %1551 = vmatprep.subr.bf16.mxu1 %v1991_v0 }
 0x1a6   :  { %v520_v48 = vpop.f32.mrb[4].mxu0 }
 0x1a7   :  { %v2214_v49 = vadd.f32 %v520_v48, %v437_v46  ;;  %v1535_v50 = vpop.f32.mrb[5].mxu0 }
 0x1a8   :  { %v523_v51 = vpop.f32.mrb[6].mxu0  ;;  %1552 = vmatpush3.bf16.msra.mxu1 %v1700_v47 }
 0x1a9   :  { %v526_v52 = vpack.c.bf16 %v2214_v49, %v2214_v49  ;;  %v1536_v53 = vpop.f32.mrb[7].mxu0  ;;  %1563 = vmatprep.subr.bf16.mxu1 %v1991_v0 }
 0x1ab   :  { %1554 = vmatmul.mubr.bf16.vlgmr.msra.gmra.mrb[4].mxu1 %v526_v52 }
 0x1ac   :  { %1579 = vmatprep.mubr.msk.bf16.mxu1 %vm1992_vm0, %v1991_v0  ;;  %1564 = vmatpush3.bf16.msra.mxu1 %v1701_v54 }
 0x1ad   :  { %1565 = vmatprep.subr.bf16.mxu1 %v1991_v0 }
 0x1b0   :  { %1566 = vmatpush3.bf16.msra.mxu1 %v1702_v55 }
 0x1b1   :  { %1567 = vmatprep.subr.bf16.mxu1 %v1991_v0 }
 0x1b4   :  { %1568 = vmatpush3.bf16.msra.mxu1 %v1703_v56 }
 0x1b5   :  { %1569 = vmatprep.subr.bf16.mxu1 %v1991_v0 }
 0x1b8   :  { %1570 = vmatpush3.bf16.msra.mxu1 %v1704_v57 }
 0x1b9   :  { %1571 = vmatprep.subr.bf16.mxu1 %v1991_v0 }
 0x1bc   :  { %1572 = vmatpush3.bf16.msra.mxu1 %v1705_v58  ;;  %v2250_v58 = vsub.s32 2, %v2188_v28 }
 0x1bd   :  { %1573 = vmatprep.subr.bf16.mxu1 %v1991_v0 }
 0x1c0   :  { %1574 = vmatpush3.bf16.msra.mxu1 %v1706_v59 }
 0x1c1   :  { %1575 = vmatprep.subr.bf16.mxu1 %v1991_v0 }
 0x1c4   :  { %1576 = vmatpush3.bf16.msra.mxu1 %v1707_v60 }
 0x1c5   :  { %1577 = vmatprep.subr.bf16.mxu1 %v1991_v0 }
 0x1c8   :  { %1578 = vmatpush3.bf16.msra.mxu1 %v1708_v61 }
 0x1c9   :  { %1603 = vmatprep.subr.bf16.mxu1 %v1991_v0 }
 0x1cb   :  { %1580 = vmatmul.mubr.bf16.vlgmr.msra.gmra.mrb[8].mxu1 %v2166_v13 }
 0x1cc   :  { %1604 = vmatpush3.bf16.msra.mxu1 %v1709_v62  ;;  %1619 = vmatprep.mubr.msk.bf16.mxu1 %vm1992_vm0, %v1991_v0  ;;  %v412_v62 = vrot.slane %v2193_v30, %v2250_v58 }
 0x1cd   :  { %1605 = vmatprep.subr.bf16.mxu1 %v1991_v0 }
 0x1d0   :  { %1606 = vmatpush3.bf16.msra.mxu1 %v1710_v63  ;;  %v2255_v63 = vsub.s32 3, %v2188_v28 }
 0x1d1   :  { %1607 = vmatprep.subr.bf16.mxu1 %v1991_v0 }
 0x1d4   :  { %1608 = vmatpush3.bf16.msra.mxu1 %v1711_v1 }
 0x1d5   :  { %1609 = vmatprep.subr.bf16.mxu1 %v1991_v0 }
 0x1d8   :  { %1610 = vmatpush3.bf16.msra.mxu1 %v1712_v2 }
 0x1d9   :  { %1611 = vmatprep.subr.bf16.mxu1 %v1991_v0 }
 0x1dc   :  { %1612 = vmatpush3.bf16.msra.mxu1 %v1713_v3  ;;  %v417_v3 = vrot.slane %v2193_v30, %v2255_v63 }
 0x1dd   :  { %1613 = vmatprep.subr.bf16.mxu1 %v1991_v0 }
 0x1e0   :  { %1614 = vmatpush3.bf16.msra.mxu1 %v1714_v4 }
 0x1e1   :  { %1615 = vmatprep.subr.bf16.mxu1 %v1991_v0 }
 0x1e4   :  { %1616 = vmatpush3.bf16.msra.mxu1 %v1715_v5 }
 0x1e5   :  { %1617 = vmatprep.subr.bf16.mxu1 %v1991_v0 }
 0x1e8   :  { %1618 = vmatpush3.bf16.msra.mxu1 %v1716_v6  ;;  %v641_v6 = vrot.slane %v2208_v45, %v2250_v58 }
 0x1e9   :  { %1643 = vmatprep.subr.bf16.mxu1 %v1991_v0 }
 0x1eb   :  { %1620 = vmatmul.mubr.bf16.vlgmr.msra.gmra.mrb[12].mxu1 %v1016_v8 }
 0x1ec   :  { %1645 = vmatprep.mubr.msk.bf16.mxu1 %vm1992_vm0, %v1991_v0 }
 0x25e   :  { %v383_v10 = vpop.f32.mrb[0].mxu1 }
 0x25f   :  { %v384_v11 = vadd.f32 %v383_v10, %v300_v9  ;;  %v1515_v12 = vpop.f32.mrb[1].mxu1  ;;  %v646_v10 = vrot.slane %v2208_v45, %v2255_v63 }
 0x260   :  { %v386_v13 = vpop.f32.mrb[2].mxu1 }
 0x261   :  { %v389_v14 = vrot.slane %v384_v11, 4  ;;  %v1516_v15 = vpop.f32.mrb[3].mxu1 }
 0x263   :  { %v390_v16 = vadd.f32 %v389_v14, %v384_v11 }
 0x265   :  { %v391_v17 = vrot.slane %v390_v16, 2 }
 0x267   :  { %v392_v18 = vadd.f32 %v391_v17, %v390_v16 }
 0x269   :  { %v393_v19 = vrot.slane %v392_v18, 1 }
 0x26b   :  { %v394_v20 = vadd.f32 %v393_v19, %v392_v18 }
 0x26d   :  { %v396_v21 = vmul.f32 0.125, %v394_v20 }
 0x26f   :  { %v397_v22 = vsub.f32 %v384_v11, %v396_v21 }
 0x271   :  { %v398_v23 = vmul.f32 %v397_v22, %v397_v22 }
 0x273   :  { %v399_v24 = vrot.slane %v398_v23, 4 }
 0x275   :  { %v400_v25 = vadd.f32 %v399_v24, %v398_v23 }
 0x277   :  { %v401_v27 = vrot.slane %v400_v25, 2 }
 0x279   :  { %v402_v35 = vadd.f32 %v401_v27, %v400_v25 }
 0x27b   :  { %v403_v40 = vrot.slane %v402_v35, 1 }
 0x27d   :  { %v404_v43 = vadd.f32 %v403_v40, %v402_v35  ;;  %v1993_v35 = vmov 0  }
 0x27e   :  { %v613_v31 = vpop.f32.mrb[4].mxu1  ;;  %1667 = vset.pattern.permute.xlu0 %v1993_v35  ;;  %1668 = vset.pattern.permute.xlu1 %v1993_v35 }
 0x27f   :  { %v614_v32 = vadd.f32 %v613_v31, %v530_v26  ;;  %v1555_v34 = vpop.f32.mrb[5].mxu1  ;;  %v405_v47 = vmul.f32 0.125, %v404_v43  ;;  %v1717_v43 = vld [vmem:[#allocation7 + $0xc0] sm:$0xff]  }
 0x280   :  { %v616_v36 = vpop.f32.mrb[6].mxu1  ;;  %v703_v34 = vld [vmem:[#allocation13] sm:$0xff] }
 0x281   :  { %v619_v37 = vrot.slane %v614_v32, 4  ;;  %v1556_v38 = vpop.f32.mrb[7].mxu1  ;;  %v406_v51 = vadd.f32 1e-05, %v405_v47  ;;  %v1719_v47 = vld [vmem:[#allocation7 + $0xd0] sm:$0xff]  }
 0x283   :  { %v620_v39 = vadd.f32 %v619_v37, %v614_v32  ;;  %1733 = vrsqrt.f32 %v406_v51  ;;  %v1722_v51 = vld [vmem:[#allocation7 + $0xe8] sm:$0xff]  }
 0x285   :  { %v621_v41 = vrot.slane %v620_v39, 2 }
 0x287   :  { %v622_v42 = vadd.f32 %v621_v41, %v620_v39 }
 0x289   :  { %v623_v44 = vrot.slane %v622_v42, 1 }
 0x28b   :  { %v624_v46 = vadd.f32 %v623_v44, %v622_v42 }
 0x28d   :  { %v625_v48 = vmul.f32 0.125, %v624_v46  ;;  %v1734_v60 = vpop.eup %1733  ;;  %v1718_v46 = vld [vmem:[#allocation7 + $0xc8] sm:$0xff]  }
 0x28e   :  { %v408_v1 = vmul.f32 %v1734_v60, %v397_v22  ;;  %v1726_v60 = vld [vmem:[#allocation10 + $0xc8] sm:$0xff]  }
 0x28f   :  { %v626_v50 = vsub.f32 %v614_v32, %v625_v48  ;;  %v1720_v48 = vld [vmem:[#allocation7 + $0xd8] sm:$0xff]  }
 0x290   :  { %v413_v4 = vmul.f32 %v412_v62, %v408_v1  ;;  %v1728_v62 = vld [vmem:[#allocation10 + $0xd8] sm:$0xff]   ;;  %v1729_v1 = vld [vmem:[#allocation10 + $0xe0] sm:$0xff]  }
 0x291   :  { %v627_v52 = vmul.f32 %v626_v50, %v626_v50 }
 0x292   :  { %v418_v5 = vadd.f32 %v417_v3, %v413_v4  ;;  %v2292_v3 = vld [vmem:[#allocation11 + $0x4] sm:$0xf] }
 0x293   :  { %v628_v53 = vrot.slane %v627_v52, 4  ;;  %v1022_v4 = vrot.slane %v2292_v3, %v2191_v29 }
 0x294   :  { %v1347_v9 = vmul.f32 -1.442695, %v418_v5  ;;  %v1731_v5 = vld [vmem:[#allocation10 + $0xf0] sm:$0xff]  }
 0x295   :  { %v629_v54 = vadd.f32 %v628_v53, %v627_v52  ;;  %v2274_v52 = vld [vmem:[#allocation8 + $0x4] sm:$0xf] }
 0x296   :  { %v791_v53 = vrot.slane %v2274_v52, %v2191_v29 }
 0x297   :  { %v630_v55 = vrot.slane %v629_v54, 2 }
 0x299   :  { %v631_v56 = vadd.f32 %v630_v55, %v629_v54  ;;  %v1723_v54 = vld [vmem:[#allocation7 + $0xf0] sm:$0xff]  }
 0x29b   :  { %v632_v57 = vrot.slane %v631_v56, 1 }
 0x29d   :  { %v633_v59 = vadd.f32 %v632_v57, %v631_v56  ;;  %v1724_v56 = vld [vmem:[#allocation7 + $0xf8] sm:$0xff]  }
 0x29e   :  { %v874_v22 = vpop.f32.mrb[8].mxu1 }
 0x29f   :  { %v634_v61 = vmul.f32 0.125, %v633_v59  ;;  %v1581_v23 = vpop.f32.mrb[9].mxu1  ;;  %v2280_v55 = vadd.f32 %v874_v22, %v791_v53  ;;  %v1725_v59 = vld [vmem:[#allocation10 + $0xc0] sm:$0xff]  }
 0x2a0   :  { %v877_v24 = vpop.f32.mrb[10].mxu1 }
 0x2a1   :  { %v635_v2 = vadd.f32 1e-05, %v634_v61  ;;  %v1582_v25 = vpop.f32.mrb[11].mxu1  ;;  %v880_v57 = vpack.c.bf16 %v2280_v55, %v2280_v55  ;;  %v1727_v61 = vld [vmem:[#allocation10 + $0xd0] sm:$0xff]  }
 0x2a3   :  { %1735 = vrsqrt.f32 %v635_v2  ;;  %v1730_v2 = vld [vmem:[#allocation10 + $0xe8] sm:$0xff]  }
 0x2a4   :  { %1737 = vpow2.f32 %v1347_v9 }
 0x2ad   :  { %v1736_v8 = vpop.eup %1735 }
 0x2ae   :  { %v637_v11 = vmul.f32 %v1736_v8, %v626_v50  ;;  %v1738_v14 = vpop.eup %1737  ;;  %v1721_v50 = vld [vmem:[#allocation7 + $0xe0] sm:$0xff]  }
 0x2af   :  { %v422_v15 = vadd.f32 1.0, %v1738_v14  ;;  %v1732_v8 = vld [vmem:[#allocation10 + $0xf8] sm:$0xff]  }
 0x2b0   :  { %v642_v12 = vmul.f32 %v641_v6, %v637_v11 }
 0x2b2   :  { %v647_v28 = vadd.f32 %v646_v10, %v642_v12 }
 0x2b4   :  { %v1364_v13 = vmul.f32 -1.442695, %v647_v28  ;;  %v884_v28 = vrot.slane %v2274_v52, %v2239_v7 }
 0x2b6   :  { %1739 = vpow2.f32 %v1364_v13 }
 0x2b7   :  { %1741 = vrcp.f32 %v422_v15 }
 0x2be   :  { %v2265_v26 = vpop.f32.mrb[12].mxu1 }
 0x2bf   :  { %v1621_v27 = vpop.f32.mrb[13].mxu1  ;;  %v2299_v6 = vadd.f32 %v2265_v26, %v1022_v4  ;;  %v1115_v26 = vrot.slane %v2292_v3, %v2239_v7 }
 0x2c0   :  { %v1740_v16 = vpop.eup %1739  ;;  %v1108_v31 = vpop.f32.mrb[14].mxu1 }
 0x2c1   :  { %v651_v30 = vadd.f32 1.0, %v1740_v16  ;;  %v1742_v17 = vpop.eup %1741  ;;  %v1622_v32 = vpop.f32.mrb[15].mxu1  ;;  %v1111_v9 = vpack.c.bf16 %v2299_v6, %v2299_v6 }
 0x2c2   :  { %v425_v21 = vmul.f32 %v1742_v17, %v2197_v33 }
 0x2c3   :  { %1743 = vrcp.f32 %v651_v30 }
 0x2c4   :  { %v426_v45 = vmul.f32 %v425_v21, %v425_v21 }
 0x2cd   :  { %v1744_v18 = vpop.eup %1743 }
 0x2ce   :  { %v654_v19 = vmul.f32 %v1744_v18, %v2214_v49 }
 0x2d0   :  { %v655_v20 = vmul.f32 %v654_v19, %v654_v19 }
 0x2d2   :  { %656 = vadd.xlane.f32.xlu0 %v655_v20 }
 0x2d6   :  { %427 = vadd.xlane.f32.xlu0 %v426_v45 }
 0x2ec   :  { %707 = vperm.xlu0 %1667, %v703_v34  }
 0x35f   :  { %v657_v49 = vpop.xlane.xlu0 %656 }
 0x360   :  { %v658_v36 = vmax.f32 %v657_v49, 1e-24 }
 0x362   :  { %1745 = vrsqrt.f32 %v658_v36 }
 0x363   :  { %v428_v33 = vpop.xlane.xlu0 %427 }
 0x364   :  { %v429_v37 = vmax.f32 %v428_v33, 1e-24 }
 0x366   :  { %1747 = vrsqrt.f32 %v429_v37 }
 0x36c   :  { %v1746_v38 = vpop.eup %1745 }
 0x36d   :  { %v660_v39 = vmul.f32 %v1746_v38, %v654_v19 }
 0x36f   :  { %v662_v40 = vpack.c.bf16 %v660_v39, %v660_v39 }
 0x370   :  { %v1748_v41 = vpop.eup %1747 }
 0x371   :  { %1558 = vmatpush3.bf16.xpose.msra.mxu0 %v662_v40  ;;  %v431_v42 = vmul.f32 %v1748_v41, %v425_v21 }
 0x372   :  { %1583 = vmatprep.subr.bf16.mxu0 %v1991_v0 }
 0x373   :  { %v661_v44 = vpack.c.bf16 %v431_v42, %v431_v42 }
 0x378   :  { %1560 = vmatmul.mubr.bf16.vlgmr.msra.gmra.mrb[8].mxu0 %v661_v44 }
 0x379   :  { %1584 = vmatpush3.bf16.msra.mxu0 %v1717_v43  ;;  %1599 = vmatprep.mubr.msk.bf16.mxu0 %vm1992_vm0, %v1991_v0 }
 0x37a   :  { %1585 = vmatprep.subr.bf16.mxu0 %v1991_v0 }
 0x37d   :  { %1586 = vmatpush3.bf16.msra.mxu0 %v1718_v46 }
 0x37e   :  { %1587 = vmatprep.subr.bf16.mxu0 %v1991_v0 }
 0x381   :  { %1588 = vmatpush3.bf16.msra.mxu0 %v1719_v47 }
 0x382   :  { %1589 = vmatprep.subr.bf16.mxu0 %v1991_v0 }
 0x385   :  { %1590 = vmatpush3.bf16.msra.mxu0 %v1720_v48 }
 0x386   :  { %1591 = vmatprep.subr.bf16.mxu0 %v1991_v0 }
 0x389   :  { %1592 = vmatpush3.bf16.msra.mxu0 %v1721_v50 }
 0x38a   :  { %1593 = vmatprep.subr.bf16.mxu0 %v1991_v0 }
 0x38d   :  { %1594 = vmatpush3.bf16.msra.mxu0 %v1722_v51 }
 0x38e   :  { %1595 = vmatprep.subr.bf16.mxu0 %v1991_v0 }
 0x391   :  { %1596 = vmatpush3.bf16.msra.mxu0 %v1723_v54 }
 0x392   :  { %1597 = vmatprep.subr.bf16.mxu0 %v1991_v0 }
 0x395   :  { %1598 = vmatpush3.bf16.msra.mxu0 %v1724_v56 }
 0x396   :  { %1623 = vmatprep.subr.bf16.mxu0 %v1991_v0 }
 0x398   :  { %1600 = vmatmul.mubr.bf16.vlgmr.msra.gmra.mrb[12].mxu0 %v880_v57 }
 0x399   :  { %1624 = vmatpush3.bf16.msra.mxu0 %v1725_v59  ;;  %1639 = vmatprep.mubr.msk.bf16.mxu0 %vm1992_vm0, %v1991_v0 }
 0x39a   :  { %1625 = vmatprep.subr.bf16.mxu0 %v1991_v0 }
 0x39d   :  { %1626 = vmatpush3.bf16.msra.mxu0 %v1726_v60 }
 0x39e   :  { %1627 = vmatprep.subr.bf16.mxu0 %v1991_v0 }
 0x3a1   :  { %1628 = vmatpush3.bf16.msra.mxu0 %v1727_v61  ;;  %v995_v61 = vrot.slane %v2274_v52, %v2250_v58 }
 0x3a2   :  { %1629 = vmatprep.subr.bf16.mxu0 %v1991_v0 }
 0x3a5   :  { %1630 = vmatpush3.bf16.msra.mxu0 %v1728_v62 }
 0x3a6   :  { %1631 = vmatprep.subr.bf16.mxu0 %v1991_v0 }
 0x3a9   :  { %1632 = vmatpush3.bf16.msra.mxu0 %v1729_v1 }
 0x3aa   :  { %1633 = vmatprep.subr.bf16.mxu0 %v1991_v0 }
 0x3ad   :  { %1634 = vmatpush3.bf16.msra.mxu0 %v1730_v2  ;;  %v1000_v2 = vrot.slane %v2274_v52, %v2255_v63 }
 0x3ae   :  { %1635 = vmatprep.subr.bf16.mxu0 %v1991_v0 }
 0x3b1   :  { %1636 = vmatpush3.bf16.msra.mxu0 %v1731_v5 }
 0x3b2   :  { %1637 = vmatprep.subr.bf16.mxu0 %v1991_v0 }
 0x3b5   :  { %1638 = vmatpush3.bf16.msra.mxu0 %v1732_v8  ;;  %v1226_v8 = vrot.slane %v2292_v3, %v2250_v58 }
 0x3b8   :  { %1640 = vmatmul.mubr.bf16.vlgmr.msra.gmra.mrb[16].mxu0 %v1111_v9 }
 0x44b   :  { %v2304_v10 = vpop.f32.mrb[8].mxu0 }
 0x44c   :  { %v1561_v11 = vpop.f32.mrb[9].mxu0 }
 0x44d   :  { %v700_v29 = vpop.f32.mrb[10].mxu0 }
 0x44e   :  { %v1562_v12 = vpop.f32.mrb[11].mxu0  ;;  %v1231_v29 = vrot.slane %v2292_v3, %v2255_v63  ;;  %v1289_v3 = vld [vmem:[#allocation13 + $0x8] sm:$0xff] }
 0x46b   :  { %v967_v13 = vpop.f32.mrb[12].mxu0 }
 0x46c   :  { %v968_v14 = vadd.f32 %v967_v13, %v884_v28  ;;  %v1601_v15 = vpop.f32.mrb[13].mxu0 }
 0x46d   :  { %v970_v16 = vpop.f32.mrb[14].mxu0 }
 0x46e   :  { %v973_v30 = vrot.slane %v968_v14, 4  ;;  %v1602_v17 = vpop.f32.mrb[15].mxu0 }
 0x470   :  { %v974_v0 = vadd.f32 %v973_v30, %v968_v14 }
 0x472   :  { %v975_v18 = vrot.slane %v974_v0, 2 }
 0x474   :  { %v976_v19 = vadd.f32 %v975_v18, %v974_v0 }
 0x476   :  { %v977_v20 = vrot.slane %v976_v19, 1 }
 0x478   :  { %v978_v21 = vadd.f32 %v977_v20, %v976_v19 }
 0x47a   :  { %v979_v45 = vmul.f32 0.125, %v978_v21 }
 0x47c   :  { %v980_v22 = vsub.f32 %v968_v14, %v979_v45 }
 0x47e   :  { %v981_v23 = vmul.f32 %v980_v22, %v980_v22 }
 0x480   :  { %v982_v24 = vrot.slane %v981_v23, 4 }
 0x482   :  { %v983_v25 = vadd.f32 %v982_v24, %v981_v23 }
 0x484   :  { %v984_v27 = vrot.slane %v983_v25, 2 }
 0x486   :  { %v985_v35 = vadd.f32 %v984_v27, %v983_v25 }
 0x488   :  { %v986_v38 = vrot.slane %v985_v35, 1 }
 0x48a   :  { %v987_v41 = vadd.f32 %v986_v38, %v985_v35 }
 0x48b   :  { %v1198_v31 = vpop.f32.mrb[16].mxu0 }
 0x48c   :  { %v1199_v32 = vadd.f32 %v1198_v31, %v1115_v26  ;;  %v1641_v34 = vpop.f32.mrb[17].mxu0  ;;  %v988_v44 = vmul.f32 0.125, %v987_v41 }
 0x48d   :  { %v1201_v49 = vpop.f32.mrb[18].mxu0  ;;  %v708_v34 = vpop.permute.xlu0 %707 }
 0x48e   :  { %v1204_v36 = vrot.slane %v1199_v32, 4  ;;  %v1642_v33 = vpop.f32.mrb[19].mxu0  ;;  %v989_v48 = vadd.f32 1e-05, %v988_v44 }
 0x490   :  { %v1205_v37 = vadd.f32 %v1204_v36, %v1199_v32  ;;  %1749 = vrsqrt.f32 %v989_v48 }
 0x492   :  { %v1206_v39 = vrot.slane %v1205_v37, 2 }
 0x494   :  { %v1207_v40 = vadd.f32 %v1206_v39, %v1205_v37 }
 0x496   :  { %v1208_v42 = vrot.slane %v1207_v40, 1 }
 0x498   :  { %v1209_v43 = vadd.f32 %v1208_v42, %v1207_v40 }
 0x49a   :  { %v1210_v46 = vmul.f32 0.125, %v1209_v43  ;;  %v1750_v59 = vpop.eup %1749 }
 0x49b   :  { %v991_v62 = vmul.f32 %v1750_v59, %v980_v22 }
 0x49c   :  { %v1211_v47 = vsub.f32 %v1199_v32, %v1210_v46  ;;  %v1365_v32 = vld [vmem:[#allocation14] ss:$0 sm:$0xff] }
 0x49d   :  { %v996_v4 = vmul.f32 %v995_v61, %v991_v62  ;;  %v716_v49 = vmul.f32 %v1365_v32, %v708_v34 }
 0x49e   :  { %v1212_v7 = vmul.f32 %v1211_v47, %v1211_v47 }
 0x49f   :  { %v1001_v5 = vadd.f32 %v1000_v2, %v996_v4  ;;  %v717_v38 = vmul.f32 %v716_v49, %v2304_v10 }
 0x4a0   :  { %v1213_v50 = vrot.slane %v1212_v7, 4 }
 0x4a1   :  { %v1382_v11 = vmul.f32 -1.442695, %v1001_v5 }
 0x4a2   :  { %v1214_v51 = vadd.f32 %v1213_v50, %v1212_v7 }
 0x4a4   :  { %v1215_v53 = vrot.slane %v1214_v51, 2 }
 0x4a6   :  { %v1216_v54 = vadd.f32 %v1215_v53, %v1214_v51 }
 0x4a8   :  { %v1217_v56 = vrot.slane %v1216_v54, 1 }
 0x4aa   :  { %v1218_v57 = vadd.f32 %v1217_v56, %v1216_v54 }
 0x4ac   :  { %v1219_v60 = vmul.f32 0.125, %v1218_v57 }
 0x4ae   :  { %v1220_v1 = vadd.f32 1e-05, %v1219_v60 }
 0x4b0   :  { %1751 = vrsqrt.f32 %v1220_v1 }
 0x4b1   :  { %1753 = vpow2.f32 %v1382_v11 }
 0x4ba   :  { %v1752_v9 = vpop.eup %1751 }
 0x4bb   :  { %v1222_v12 = vmul.f32 %v1752_v9, %v1211_v47  ;;  %v1754_v15 = vpop.eup %1753 }
 0x4bc   :  { %v1005_v16 = vadd.f32 1.0, %v1754_v15 }
 0x4bd   :  { %v1227_v28 = vmul.f32 %v1226_v8, %v1222_v12 }
 0x4bf   :  { %v1232_v13 = vadd.f32 %v1231_v29, %v1227_v28 }
 0x4c1   :  { %v1399_v14 = vmul.f32 -1.442695, %v1232_v13 }
 0x4c3   :  { %1755 = vpow2.f32 %v1399_v14 }
 0x4c4   :  { %1757 = vrcp.f32 %v1005_v16 }
 0x4cd   :  { %v1756_v30 = vpop.eup %1755 }
 0x4ce   :  { %v1236_v52 = vadd.f32 1.0, %v1756_v30  ;;  %v1758_v17 = vpop.eup %1757 }
 0x4cf   :  { %v1008_v19 = vmul.f32 %v1758_v17, %v2280_v55  ;;  %v1400_v55 = vld [vmem:[#allocation14 + $0x1] ss:$0 sm:$0xff] }
 0x4d0   :  { %1759 = vrcp.f32 %v1236_v52 }
 0x4d1   :  { %v1009_v63 = vmul.f32 %v1008_v19, %v1008_v19 }
 0x4da   :  { %v1760_v0 = vpop.eup %1759 }
 0x4db   :  { %v1239_v58 = vmul.f32 %v1760_v0, %v2299_v6 }
 0x4dd   :  { %v1240_v18 = vmul.f32 %v1239_v58, %v1239_v58 }
 0x4df   :  { %1241 = vadd.xlane.f32.xlu1 %v1240_v18 }
 0x4e3   :  { %1010 = vadd.xlane.f32.xlu1 %v1009_v63 }
 0x4f4   :  { %1294 = vperm.xlu1 %1668, %v1289_v3  }
 0x56c   :  { %v1242_v20 = vpop.xlane.xlu1 %1241 }
 0x56d   :  { %v1243_v21 = vmax.f32 %v1242_v20, 1e-24 }
 0x56f   :  { %1761 = vrsqrt.f32 %v1243_v21 }
 0x570   :  { %v1011_v45 = vpop.xlane.xlu1 %1010 }
 0x571   :  { %v1012_v22 = vmax.f32 %v1011_v45, 1e-24 }
 0x573   :  { %1763 = vrsqrt.f32 %v1012_v22 }
 0x574   :  { %v1295_v31 = vpop.permute.xlu1 %1294 }
 0x575   :  { %v1303_v35 = vmul.f32 %v1400_v55, %v1295_v31 }
 0x577   :  { %v1306_v36 = vadd.f32 %v1303_v35, %v716_v49 }
 0x579   :  { %v1762_v23 = vpop.eup %1761  ;;  %v1307_v33 = vmax.f32 %v1306_v36, 1e-12 }
 0x57a   :  { %v1245_v24 = vmul.f32 %v1762_v23, %v1239_v58 }
 0x57b   :  { %1765 = vrcp.f32 %v1307_v33 }
 0x57c   :  { %v1247_v25 = vpack.c.bf16 %v1245_v24, %v1245_v24 }
 0x57d   :  { %v1764_v26 = vpop.eup %1763 }
 0x57e   :  { %1644 = vmatpush3.bf16.xpose.msra.mxu1 %v1247_v25  ;;  %v1014_v6 = vmul.f32 %v1764_v26, %v1008_v19 }
 0x580   :  { %v1246_v27 = vpack.c.bf16 %v1014_v6, %v1014_v6 }
 0x585   :  { %1646 = vmatmul.mubr.bf16.vlgmr.msra.gmra.mrb[16].mxu1 %v1246_v27  ;;  %v1766_v41 = vpop.eup %1765 }
 0x658   :  { %v1282_v37 = vpop.f32.mrb[16].mxu1 }
 0x659   :  { %v1304_v39 = vmul.f32 %v1303_v35, %v1282_v37  ;;  %v1647_v40 = vpop.f32.mrb[17].mxu1 }
 0x65a   :  { %v1285_v42 = vpop.f32.mrb[18].mxu1 }
 0x65b   :  { %v1305_v43 = vadd.f32 %v1304_v39, %v717_v38  ;;  %v1648_v44 = vpop.f32.mrb[19].mxu1 }
 0x65d   :  { %v1309_v46 = vmul.f32 %v1766_v41, %v1305_v43 }
 0x65f   :  { %1311 = vst.msk [vmem:[#allocation16] sm:$0xff] %vm1310_vm1, %v1309_v46 }
 0x660   :  { %1954 = shalt.err (!%p1951_p12)
}
 0x661   :  { %s1955_s11 = scalar_lea.hbm %s2341_s8, 128 }
 0x662   :  { %p1956_p13 = scmp.ne.s32.totalorder %s2341_s8, %s1955_s11  ;;  %p1959_p0 = scmp.lt.u32.totalorder %s1955_s11, %s2341_s8 }
 0x664   :  { %p1961_p1 = pnand %p1959_p0, %p1956_p13 }
 0x666   :  { %1964 = shalt.err (!%p1961_p1)
}
 0x667   :  { %1321 = dma.vmem_to_hbm [thread:$0]  %s1319_s2, 128, %s2341_s8, [#allocation4]  }
 0x668   :  { %1975 = dma.done.wait [#allocation4], 128  }
 0x669   :  { %1976 = vsyncadd [#allocation4], 4294967168 }
 0x66a   :  { %1325 = vsyncpa [#allocation3], 1 }
 0x66b   :  { %1326 = vsyncpa [#allocation6], 1 }
 0x66c   :  { %1327 = vsyncpa [#allocation9], 1 }
 0x66d   :  { %1328 = vsyncpa [#allocation12], 1 }
 0x66e   :  { %1329 = vsyncpa [#allocation15], 1 }
 0x66f   :  { %1330 = vsyncpa [#allocation4], 1 }

</bundles_post_ra>
